<compile_context>
chip_gen: v7x
topology: tpu7x:2x2x1
jax: 0.10.0
libtpu: 0.0.40
codegen_flags: <defaults>
</compile_context>

<pallas_src>
import math
import jax
import jax.numpy as jnp
from jax.experimental import pallas as pl
from jax.experimental.pallas import tpu as pltpu


def netvlad_loupe_kernel(x_ref, cw_ref, cw2_ref, g1_ref, b1_ref, hw_ref,
                         g2_ref, b2_ref, gw_ref, gg_ref, gb_ref, out_ref):
    # x_ref:  (B, N, D) bf16   N = max_samples, D = feature_size
    # cw_ref: (D, K)   bf16    cluster_weights
    # cw2_ref:(D, K)   f32     cluster_weights2 (squeezed leading 1)
    # g1/b1:  (1, K)   f32     BN1 gamma/beta
    # hw_ref: (D*K, O) bf16    hidden1_weights (row index = d*K + k)
    # g2/b2:  (1, O)   f32     BN2 gamma/beta
    # gw_ref: (O, O)   bf16    gating weights
    # gg/gb:  (1, O)   f32     gating BN gamma/beta
    # out:    (B, O)   f32
    B, N, D = x_ref.shape
    K = cw_ref.shape[1]
    eps = 1e-5

    x = x_ref[...]                                    # (B, N, D) bf16, no upcast
    xb = x.reshape(B * N, D)                          # leading-dim merge (cheap)

    # activation = x @ cluster_weights  (bf16 x bf16 -> f32 on the MXU)
    act = jnp.dot(xb, cw_ref[...], preferred_element_type=jnp.float32)

    # BatchNorm1d(cluster_size), training mode: stats over the B*N rows,
    # folded to a single fused scale/shift.
    mu1 = jnp.mean(act, axis=0, keepdims=True)
    var1 = jnp.mean((act - mu1) ** 2, axis=0, keepdims=True)
    scale1 = jax.lax.rsqrt(var1 + eps) * g1_ref[...]
    act = act * scale1 + (b1_ref[...] - mu1 * scale1)

    # softmax over clusters; denominator reciprocal on the EUP
    act = jnp.exp(act - jnp.max(act, axis=-1, keepdims=True))
    act = act * pl.reciprocal(jnp.sum(act, axis=-1, keepdims=True), approx=True)

    act3 = act.reshape(B, N, K)                       # f32
    a_sum = jnp.sum(act3, axis=1, keepdims=True)      # (B, 1, K)
    a = a_sum * cw2_ref[...][None, :, :]              # (B, D, K) f32

    # fused VLAD contraction -> (B, D, K) directly (no explicit transpose)
    vlad = jnp.einsum('bnd,bnk->bdk', x, act3.astype(x.dtype),
                      preferred_element_type=jnp.float32)
    vlad = vlad - a

    # intra-normalization: F.normalize(vlad, dim=1)  (over feature dim D)
    ss1 = jnp.sum(vlad * vlad, axis=1, keepdims=True)
    vlad = vlad * jax.lax.rsqrt(jnp.maximum(ss1, 1e-24))

    # full L2 normalization of the flattened descriptor (sum over D and K)
    ss2 = jnp.sum(jnp.sum(vlad * vlad, axis=2, keepdims=True),
                  axis=1, keepdims=True)
    vlad = vlad * jax.lax.rsqrt(jnp.maximum(ss2, 1e-24))

    # flatten row-major (index d*K + k, matching the (D*K, O) weight layout),
    # done in bf16 so the sublane->lane relayout moves half the bytes.
    vlad_flat = vlad.astype(hw_ref.dtype).reshape(B, D * K)

    # hidden projection (bf16 MXU, f32 accumulate)
    h = jnp.dot(vlad_flat, hw_ref[...], preferred_element_type=jnp.float32)

    # BatchNorm1d(output_dim), training mode: stats over batch (fused form)
    mu2 = jnp.mean(h, axis=0, keepdims=True)
    var2 = jnp.mean((h - mu2) ** 2, axis=0, keepdims=True)
    scale2 = jax.lax.rsqrt(var2 + eps) * g2_ref[...]
    h = h * scale2 + (b2_ref[...] - mu2 * scale2)

    # context gating (bf16 MXU) + BN (fused) + sigmoid
    gates = jnp.dot(h.astype(gw_ref.dtype), gw_ref[...],
                    preferred_element_type=jnp.float32)
    mug = jnp.mean(gates, axis=0, keepdims=True)
    varg = jnp.mean((gates - mug) ** 2, axis=0, keepdims=True)
    scaleg = jax.lax.rsqrt(varg + eps) * gg_ref[...]
    gates = gates * scaleg + (gb_ref[...] - mug * scaleg)
    gates = jax.nn.sigmoid(gates)

    out_ref[...] = (h * gates).astype(out_ref.dtype)


def netvlad_loupe_forward(x_nchw, params):
    """x_nchw: (B, feature_size, max_samples, 1) (PyTorch NCHW convention)."""
    B, D, N, _ = x_nchw.shape
    O = params["hidden1_weights"].shape[1]
    # glue: transpose(1,3) + view -> (B, max_samples, feature_size), bf16 MXU feed.
    # TODO(synk): at production sizes consume the (B, D, N) layout directly /
    # fuse this transpose into the producer to avoid an extra HBM round trip.
    x = jnp.transpose(x_nchw, (0, 3, 2, 1)).reshape(B, N, D).astype(jnp.bfloat16)

    args = (
        x,
        params["cluster_weights"].astype(jnp.bfloat16),   # (D, K)
        params["cluster_weights2"],                       # (D, K) f32 (VPU use)
        params["bn1_gamma"], params["bn1_beta"],          # (1, K)
        params["hidden1_weights"].astype(jnp.bfloat16),   # (D*K, O)
        params["bn2_gamma"], params["bn2_beta"],          # (1, O)
        params["gating_weights"].astype(jnp.bfloat16),    # (O, O)
        params["gbn_gamma"], params["gbn_beta"],          # (1, O)
    )
    return pl.pallas_call(
        netvlad_loupe_kernel,
        out_shape=jax.ShapeDtypeStruct((B, O), jnp.float32),
        in_specs=[pl.BlockSpec(memory_space=pltpu.MemorySpace.VMEM)] * len(args),
        out_specs=pl.BlockSpec(memory_space=pltpu.MemorySpace.VMEM),
        compiler_params=pltpu.CompilerParams(
            vmem_limit_bytes=48 * 1024 * 1024),
    )(*args)


def _reference(x_nchw, p):
    """Pure-JAX reference mirroring the PyTorch forward (training-mode BN),
    evaluated at the kernel's mixed precision: the three MXU contractions see
    bf16 inputs (exactly like the kernel); all other math is f32."""
    eps = 1e-5
    f32, bf16 = jnp.float32, jnp.bfloat16
    B, D, N, _ = x_nchw.shape
    x = jnp.transpose(x_nchw, (0, 3, 2, 1)).reshape(B, N, D).astype(bf16)
    x32 = x.astype(f32)
    act = jnp.matmul(x32, p["cluster_weights"].astype(f32)).reshape(B * N, -1)
    mu = act.mean(0, keepdims=True)
    var = ((act - mu) ** 2).mean(0, keepdims=True)
    act = (act - mu) / jnp.sqrt(var + eps) * p["bn1_gamma"] + p["bn1_beta"]
    act = jax.nn.softmax(act, axis=-1).reshape(B, N, -1)
    a_sum = act.sum(1, keepdims=True)
    a = a_sum * p["cluster_weights2"][None]
    act_b = act.astype(bf16).astype(f32)               # kernel feeds bf16 P to MXU
    vlad = jnp.matmul(jnp.transpose(act_b, (0, 2, 1)), x32)
    vlad = jnp.transpose(vlad, (0, 2, 1)) - a
    vlad = vlad / jnp.maximum(
        jnp.sqrt((vlad ** 2).sum(1, keepdims=True)), 1e-12)
    vlad = vlad.reshape(B, -1)
    vlad = vlad / jnp.maximum(
        jnp.sqrt((vlad ** 2).sum(1, keepdims=True)), 1e-12)
    vlad = vlad.astype(bf16).astype(f32)               # kernel feeds bf16 vlad
    h = jnp.matmul(vlad, p["hidden1_weights"].astype(f32))
    mu2 = h.mean(0, keepdims=True)
    var2 = ((h - mu2) ** 2).mean(0, keepdims=True)
    h = (h - mu2) / jnp.sqrt(var2 + eps) * p["bn2_gamma"] + p["bn2_beta"]
    g = jnp.matmul(h.astype(bf16).astype(f32), p["gating_weights"].astype(f32))
    mug = g.mean(0, keepdims=True)
    varg = ((g - mug) ** 2).mean(0, keepdims=True)
    g = (g - mug) / jnp.sqrt(varg + eps) * p["gbn_gamma"] + p["gbn_beta"]
    return h * jax.nn.sigmoid(g)


if __name__ == "__main__":
    # Module config (small, consistent with the NetVLADLoupe forward)
    feature_size = 16   # D
    max_samples = 32    # N
    cluster_size = 8    # K
    output_dim = 32     # O
    batch = 8           # B (>2 so training-mode BN stats are well conditioned)

    key = jax.random.PRNGKey(0)
    k = jax.random.split(key, 8)

    bf16 = jnp.bfloat16
    params = {
        # MXU operands stored in bf16; BN params and the elementwise
        # cluster_weights2 stay f32.
        "cluster_weights": (jax.random.normal(
            k[0], (feature_size, cluster_size), jnp.float32)
            / math.sqrt(feature_size)).astype(bf16),
        "cluster_weights2": jax.random.normal(
            k[1], (feature_size, cluster_size), jnp.float32)
            / math.sqrt(feature_size),
        "hidden1_weights": (jax.random.normal(
            k[2], (cluster_size * feature_size, output_dim), jnp.float32)
            / math.sqrt(feature_size)).astype(bf16),
        "gating_weights": (jax.random.normal(
            k[3], (output_dim, output_dim), jnp.float32)
            / math.sqrt(output_dim)).astype(bf16),
        # BatchNorm default init: gamma=1, beta=0
        "bn1_gamma": jnp.ones((1, cluster_size), jnp.float32),
        "bn1_beta": jnp.zeros((1, cluster_size), jnp.float32),
        "bn2_gamma": jnp.ones((1, output_dim), jnp.float32),
        "bn2_beta": jnp.zeros((1, output_dim), jnp.float32),
        "gbn_gamma": jnp.ones((1, output_dim), jnp.float32),
        "gbn_beta": jnp.zeros((1, output_dim), jnp.float32),
    }

    # Input in PyTorch NCHW convention: (B, feature_size, max_samples, 1)
    x = jax.random.normal(
        k[4], (batch, feature_size, max_samples, 1), jnp.float32)

    out = jax.block_until_ready(netvlad_loupe_forward(x, params))
    ref = jax.block_until_ready(_reference(x, params))

    assert out.shape == (batch, output_dim)
    assert bool(jnp.max(jnp.abs(out - ref)) < 5e-2), "mismatch vs. reference"
    print("KERNEL_OK")
</pallas_src>

<mosaic_0001>
module attributes {stable_mosaic.version = 11 : i64} {
  func.func @netvlad_loupe_kernel(%arg0: memref<8x32x16xbf16, #tpu.memory_space<vmem>>, %arg1: memref<16x8xbf16, #tpu.memory_space<vmem>>, %arg2: memref<16x8xf32, #tpu.memory_space<vmem>>, %arg3: memref<1x8xf32, #tpu.memory_space<vmem>>, %arg4: memref<1x8xf32, #tpu.memory_space<vmem>>, %arg5: memref<128x32xbf16, #tpu.memory_space<vmem>>, %arg6: memref<1x32xf32, #tpu.memory_space<vmem>>, %arg7: memref<1x32xf32, #tpu.memory_space<vmem>>, %arg8: memref<32x32xbf16, #tpu.memory_space<vmem>>, %arg9: memref<1x32xf32, #tpu.memory_space<vmem>>, %arg10: memref<1x32xf32, #tpu.memory_space<vmem>>, %arg11: memref<8x32xf32, #tpu.memory_space<vmem>>) attributes {dimension_semantics = [], scalar_prefetch = 0 : i64, scratch_operands = 0 : i64, tpu.core_type = #tpu.core_type<tc>} {
    %c0 = arith.constant 0 : index
    %c0_0 = arith.constant 0 : index
    %c0_1 = arith.constant 0 : index
    %0 = vector.load %arg0[%c0, %c0_0, %c0_1] : memref<8x32x16xbf16, #tpu.memory_space<vmem>>, vector<8x32x16xbf16>
    %1 = vector.shape_cast %0 : vector<8x32x16xbf16> to vector<256x16xbf16>
    %c0_2 = arith.constant 0 : index
    %c0_3 = arith.constant 0 : index
    %2 = vector.load %arg1[%c0_2, %c0_3] : memref<16x8xbf16, #tpu.memory_space<vmem>>, vector<16x8xbf16>
    %cst = arith.constant dense<0.000000e+00> : vector<256x8xf32>
    %3 = tpu.matmul %1, %2, %cst {dimension_numbers = #tpu.dot_dimension_numbers<[1], [0], [0], [1], [0, 0, 1, 1], [], []>} : vector<256x16xbf16>, vector<16x8xbf16>, vector<256x8xf32> -> vector<256x8xf32>
    %cst_4 = arith.constant dense<0.000000e+00> : vector<8xf32>
    %4 = vector.multi_reduction <add>, %3, %cst_4 [0] : vector<256x8xf32> to vector<8xf32>
    %5 = vector.shape_cast %4 : vector<8xf32> to vector<1x8xf32>
    %cst_5 = arith.constant 2.560000e+02 : f32
    %6 = vector.broadcast %cst_5 : f32 to vector<1x8xf32>
    %7 = arith.divf %5, %6 : vector<1x8xf32>
    %8 = vector.broadcast %7 : vector<1x8xf32> to vector<256x8xf32>
    %9 = arith.subf %3, %8 : vector<256x8xf32>
    %10 = arith.mulf %9, %9 : vector<256x8xf32>
    %cst_6 = arith.constant dense<0.000000e+00> : vector<8xf32>
    %11 = vector.multi_reduction <add>, %10, %cst_6 [0] : vector<256x8xf32> to vector<8xf32>
    %12 = vector.shape_cast %11 : vector<8xf32> to vector<1x8xf32>
    %cst_7 = arith.constant 2.560000e+02 : f32
    %13 = vector.broadcast %cst_7 : f32 to vector<1x8xf32>
    %14 = arith.divf %12, %13 : vector<1x8xf32>
    %cst_8 = arith.constant 9.99999974E-6 : f32
    %15 = vector.broadcast %cst_8 : f32 to vector<1x8xf32>
    %16 = arith.addf %14, %15 : vector<1x8xf32>
    %17 = math.rsqrt %16 : vector<1x8xf32>
    %c0_9 = arith.constant 0 : index
    %c0_10 = arith.constant 0 : index
    %18 = vector.load %arg3[%c0_9, %c0_10] : memref<1x8xf32, #tpu.memory_space<vmem>>, vector<1x8xf32>
    %19 = arith.mulf %17, %18 : vector<1x8xf32>
    %20 = vector.broadcast %19 : vector<1x8xf32> to vector<256x8xf32>
    %21 = arith.mulf %3, %20 : vector<256x8xf32>
    %c0_11 = arith.constant 0 : index
    %c0_12 = arith.constant 0 : index
    %22 = vector.load %arg4[%c0_11, %c0_12] : memref<1x8xf32, #tpu.memory_space<vmem>>, vector<1x8xf32>
    %23 = arith.mulf %7, %19 : vector<1x8xf32>
    %24 = arith.subf %22, %23 : vector<1x8xf32>
    %25 = vector.broadcast %24 : vector<1x8xf32> to vector<256x8xf32>
    %26 = arith.addf %21, %25 : vector<256x8xf32>
    %cst_13 = arith.constant dense<0xFF800000> : vector<256xf32>
    %27 = vector.multi_reduction <maximumf>, %26, %cst_13 [1] : vector<256x8xf32> to vector<256xf32>
    %28 = vector.shape_cast %27 : vector<256xf32> to vector<256x1xf32>
    %29 = vector.broadcast %28 : vector<256x1xf32> to vector<256x8xf32>
    %30 = arith.subf %26, %29 : vector<256x8xf32>
    %31 = math.exp %30 : vector<256x8xf32>
    %cst_14 = arith.constant dense<0.000000e+00> : vector<256xf32>
    %32 = vector.multi_reduction <add>, %31, %cst_14 [1] : vector<256x8xf32> to vector<256xf32>
    %33 = vector.shape_cast %32 : vector<256xf32> to vector<256x1xf32>
    %34 = tpu.reciprocal %33 {approx = true} : vector<256x1xf32> -> vector<256x1xf32>
    %35 = vector.broadcast %34 : vector<256x1xf32> to vector<256x8xf32>
    %36 = arith.mulf %31, %35 : vector<256x8xf32>
    %37 = vector.shape_cast %36 : vector<256x8xf32> to vector<8x32x8xf32>
    %cst_15 = arith.constant dense<0.000000e+00> : vector<8x8xf32>
    %38 = vector.multi_reduction <add>, %37, %cst_15 [1] : vector<8x32x8xf32> to vector<8x8xf32>
    %39 = vector.shape_cast %38 : vector<8x8xf32> to vector<8x1x8xf32>
    %c0_16 = arith.constant 0 : index
    %c0_17 = arith.constant 0 : index
    %40 = vector.load %arg2[%c0_16, %c0_17] : memref<16x8xf32, #tpu.memory_space<vmem>>, vector<16x8xf32>
    %41 = vector.shape_cast %40 : vector<16x8xf32> to vector<1x16x8xf32>
    %42 = vector.broadcast %39 : vector<8x1x8xf32> to vector<8x16x8xf32>
    %43 = vector.broadcast %41 : vector<1x16x8xf32> to vector<8x16x8xf32>
    %44 = arith.mulf %42, %43 : vector<8x16x8xf32>
    %45 = arith.truncf %37 : vector<8x32x8xf32> to vector<8x32x8xbf16>
    "tpu.trace_start"() <{level = 10 : i32, message = "bnd,bnk->bdk"}> : () -> ()
    %cst_18 = arith.constant dense<0.000000e+00> : vector<8x16x8xf32>
    %46 = tpu.matmul %0, %45, %cst_18 {dimension_numbers = #tpu.dot_dimension_numbers<[1], [1], [2], [2], [0, 0, 0, 2, 1, 2], [0], [0]>} : vector<8x32x16xbf16>, vector<8x32x8xbf16>, vector<8x16x8xf32> -> vector<8x16x8xf32>
    "tpu.trace_stop"() : () -> ()
    %47 = arith.subf %46, %44 : vector<8x16x8xf32>
    %48 = arith.mulf %47, %47 : vector<8x16x8xf32>
    %cst_19 = arith.constant dense<0.000000e+00> : vector<8x8xf32>
    %49 = vector.multi_reduction <add>, %48, %cst_19 [1] : vector<8x16x8xf32> to vector<8x8xf32>
    %50 = vector.shape_cast %49 : vector<8x8xf32> to vector<8x1x8xf32>
    %cst_20 = arith.constant 1.000000e-24 : f32
    %51 = vector.broadcast %cst_20 : f32 to vector<8x1x8xf32>
    %52 = arith.maximumf %50, %51 : vector<8x1x8xf32>
    %53 = math.rsqrt %52 : vector<8x1x8xf32>
    %54 = vector.broadcast %53 : vector<8x1x8xf32> to vector<8x16x8xf32>
    %55 = arith.mulf %47, %54 : vector<8x16x8xf32>
    %56 = arith.mulf %55, %55 : vector<8x16x8xf32>
    %cst_21 = arith.constant dense<0.000000e+00> : vector<8x16xf32>
    %57 = vector.multi_reduction <add>, %56, %cst_21 [2] : vector<8x16x8xf32> to vector<8x16xf32>
    %58 = vector.shape_cast %57 : vector<8x16xf32> to vector<8x16x1xf32>
    %cst_22 = arith.constant dense<0.000000e+00> : vector<8x1xf32>
    %59 = vector.multi_reduction <add>, %58, %cst_22 [1] : vector<8x16x1xf32> to vector<8x1xf32>
    %60 = vector.shape_cast %59 : vector<8x1xf32> to vector<8x1x1xf32>
    %cst_23 = arith.constant 1.000000e-24 : f32
    %61 = vector.broadcast %cst_23 : f32 to vector<8x1x1xf32>
    %62 = arith.maximumf %60, %61 : vector<8x1x1xf32>
    %63 = math.rsqrt %62 : vector<8x1x1xf32>
    %64 = vector.broadcast %63 : vector<8x1x1xf32> to vector<8x16x8xf32>
    %65 = arith.mulf %55, %64 : vector<8x16x8xf32>
    %66 = arith.truncf %65 : vector<8x16x8xf32> to vector<8x16x8xbf16>
    %67 = vector.shape_cast %66 : vector<8x16x8xbf16> to vector<8x128xbf16>
    %c0_24 = arith.constant 0 : index
    %c0_25 = arith.constant 0 : index
    %68 = vector.load %arg5[%c0_24, %c0_25] : memref<128x32xbf16, #tpu.memory_space<vmem>>, vector<128x32xbf16>
    %cst_26 = arith.constant dense<0.000000e+00> : vector<8x32xf32>
    %69 = tpu.matmul %67, %68, %cst_26 {dimension_numbers = #tpu.dot_dimension_numbers<[1], [0], [0], [1], [0, 0, 1, 1], [], []>} : vector<8x128xbf16>, vector<128x32xbf16>, vector<8x32xf32> -> vector<8x32xf32>
    %cst_27 = arith.constant dense<0.000000e+00> : vector<32xf32>
    %70 = vector.multi_reduction <add>, %69, %cst_27 [0] : vector<8x32xf32> to vector<32xf32>
    %71 = vector.shape_cast %70 : vector<32xf32> to vector<1x32xf32>
    %cst_28 = arith.constant 8.000000e+00 : f32
    %72 = vector.broadcast %cst_28 : f32 to vector<1x32xf32>
    %73 = arith.divf %71, %72 : vector<1x32xf32>
    %74 = vector.broadcast %73 : vector<1x32xf32> to vector<8x32xf32>
    %75 = arith.subf %69, %74 : vector<8x32xf32>
    %76 = arith.mulf %75, %75 : vector<8x32xf32>
    %cst_29 = arith.constant dense<0.000000e+00> : vector<32xf32>
    %77 = vector.multi_reduction <add>, %76, %cst_29 [0] : vector<8x32xf32> to vector<32xf32>
    %78 = vector.shape_cast %77 : vector<32xf32> to vector<1x32xf32>
    %cst_30 = arith.constant 8.000000e+00 : f32
    %79 = vector.broadcast %cst_30 : f32 to vector<1x32xf32>
    %80 = arith.divf %78, %79 : vector<1x32xf32>
    %cst_31 = arith.constant 9.99999974E-6 : f32
    %81 = vector.broadcast %cst_31 : f32 to vector<1x32xf32>
    %82 = arith.addf %80, %81 : vector<1x32xf32>
    %83 = math.rsqrt %82 : vector<1x32xf32>
    %c0_32 = arith.constant 0 : index
    %c0_33 = arith.constant 0 : index
    %84 = vector.load %arg6[%c0_32, %c0_33] : memref<1x32xf32, #tpu.memory_space<vmem>>, vector<1x32xf32>
    %85 = arith.mulf %83, %84 : vector<1x32xf32>
    %86 = vector.broadcast %85 : vector<1x32xf32> to vector<8x32xf32>
    %87 = arith.mulf %69, %86 : vector<8x32xf32>
    %c0_34 = arith.constant 0 : index
    %c0_35 = arith.constant 0 : index
    %88 = vector.load %arg7[%c0_34, %c0_35] : memref<1x32xf32, #tpu.memory_space<vmem>>, vector<1x32xf32>
    %89 = arith.mulf %73, %85 : vector<1x32xf32>
    %90 = arith.subf %88, %89 : vector<1x32xf32>
    %91 = vector.broadcast %90 : vector<1x32xf32> to vector<8x32xf32>
    %92 = arith.addf %87, %91 : vector<8x32xf32>
    %93 = arith.truncf %92 : vector<8x32xf32> to vector<8x32xbf16>
    %c0_36 = arith.constant 0 : index
    %c0_37 = arith.constant 0 : index
    %94 = vector.load %arg8[%c0_36, %c0_37] : memref<32x32xbf16, #tpu.memory_space<vmem>>, vector<32x32xbf16>
    %cst_38 = arith.constant dense<0.000000e+00> : vector<8x32xf32>
    %95 = tpu.matmul %93, %94, %cst_38 {dimension_numbers = #tpu.dot_dimension_numbers<[1], [0], [0], [1], [0, 0, 1, 1], [], []>} : vector<8x32xbf16>, vector<32x32xbf16>, vector<8x32xf32> -> vector<8x32xf32>
    %cst_39 = arith.constant dense<0.000000e+00> : vector<32xf32>
    %96 = vector.multi_reduction <add>, %95, %cst_39 [0] : vector<8x32xf32> to vector<32xf32>
    %97 = vector.shape_cast %96 : vector<32xf32> to vector<1x32xf32>
    %cst_40 = arith.constant 8.000000e+00 : f32
    %98 = vector.broadcast %cst_40 : f32 to vector<1x32xf32>
    %99 = arith.divf %97, %98 : vector<1x32xf32>
    %100 = vector.broadcast %99 : vector<1x32xf32> to vector<8x32xf32>
    %101 = arith.subf %95, %100 : vector<8x32xf32>
    %102 = arith.mulf %101, %101 : vector<8x32xf32>
    %cst_41 = arith.constant dense<0.000000e+00> : vector<32xf32>
    %103 = vector.multi_reduction <add>, %102, %cst_41 [0] : vector<8x32xf32> to vector<32xf32>
    %104 = vector.shape_cast %103 : vector<32xf32> to vector<1x32xf32>
    %cst_42 = arith.constant 8.000000e+00 : f32
    %105 = vector.broadcast %cst_42 : f32 to vector<1x32xf32>
    %106 = arith.divf %104, %105 : vector<1x32xf32>
    %cst_43 = arith.constant 9.99999974E-6 : f32
    %107 = vector.broadcast %cst_43 : f32 to vector<1x32xf32>
    %108 = arith.addf %106, %107 : vector<1x32xf32>
    %109 = math.rsqrt %108 : vector<1x32xf32>
    %c0_44 = arith.constant 0 : index
    %c0_45 = arith.constant 0 : index
    %110 = vector.load %arg9[%c0_44, %c0_45] : memref<1x32xf32, #tpu.memory_space<vmem>>, vector<1x32xf32>
    %111 = arith.mulf %109, %110 : vector<1x32xf32>
    %112 = vector.broadcast %111 : vector<1x32xf32> to vector<8x32xf32>
    %113 = arith.mulf %95, %112 : vector<8x32xf32>
    %c0_46 = arith.constant 0 : index
    %c0_47 = arith.constant 0 : index
    %114 = vector.load %arg10[%c0_46, %c0_47] : memref<1x32xf32, #tpu.memory_space<vmem>>, vector<1x32xf32>
    %115 = arith.mulf %99, %111 : vector<1x32xf32>
    %116 = arith.subf %114, %115 : vector<1x32xf32>
    %117 = vector.broadcast %116 : vector<1x32xf32> to vector<8x32xf32>
    %118 = arith.addf %113, %117 : vector<8x32xf32>
    %119 = arith.negf %118 : vector<8x32xf32>
    %120 = math.exp %119 : vector<8x32xf32>
    %cst_48 = arith.constant 1.000000e+00 : f32
    %121 = vector.broadcast %cst_48 : f32 to vector<8x32xf32>
    %122 = arith.addf %121, %120 : vector<8x32xf32>
    %123 = arith.divf %121, %122 : vector<8x32xf32>
    %124 = arith.mulf %92, %123 : vector<8x32xf32>
    %c0_49 = arith.constant 0 : index
    %c0_50 = arith.constant 0 : index
    %125 = vector.load %arg11[%c0_49, %c0_50] : memref<8x32xf32, #tpu.memory_space<vmem>>, vector<8x32xf32>
    tpu.vector_store %arg11[%c0_49, %c0_50], %124 {strides = array<i32>} : memref<8x32xf32, #tpu.memory_space<vmem>>, vector<8x32xf32>,
    return
  }
}

</mosaic_0001>

<bundles_post_ra>
// kernel: tpu_custom_call.1
= control target key start
LH: loop header
LB: loop body
LE: loop exit
PB: predicated region body
PF: predicated region fallthrough
CT: control target
= control target key end

     0   :  { %vm160_vm0 = vcmask 130048   ;;  %s4169_s0 = inlined_call_operand.vmem [shape: bf16[8,32,16], index: 0, kind: input, shape index: {}]   ;;  %s4170_s1 = inlined_call_operand.vmem [shape: bf16[16,8], index: 1, kind: input, shape index: {}]   ;;  %s4171_s2 = inlined_call_operand.vmem [shape: f32[16,8], index: 2, kind: input, shape index: {}]   ;;  %s4172_s3 = inlined_call_operand.vmem [shape: f32[1,8], index: 3, kind: input, shape index: {}]   ;;  %s4173_s4 = inlined_call_operand.vmem [shape: f32[1,8], index: 4, kind: input, shape index: {}]   ;;  %s4174_s5 = inlined_call_operand.vmem [shape: bf16[128,32], index: 5, kind: input, shape index: {}]   ;;  %s4175_s6 = inlined_call_operand.vmem [shape: f32[1,32], index: 6, kind: input, shape index: {}]   ;;  %s4176_s7 = inlined_call_operand.vmem [shape: f32[1,32], index: 7, kind: input, shape index: {}]   ;;  %s4177_s8 = inlined_call_operand.vmem [shape: bf16[32,32], index: 8, kind: input, shape index: {}]   ;;  %s4178_s9 = inlined_call_operand.vmem [shape: f32[1,32], index: 9, kind: input, shape index: {}]   ;;  %s4179_s10 = inlined_call_operand.vmem [shape: f32[1,32], index: 10, kind: input, shape index: {}]   ;;  %s4180_s11 = inlined_call_operand.hbm [shape: f32[8,32], index: 11, kind: output, shape index: {}]  }
   0x1   :  { %v2711_v0 = vld [vmem:[%s4170_s1] sm:$0xff]   ;;  %v2713_v2 = vld [vmem:[%s4169_s0 + $0x8] sm:$0xff]   ;;  %v2714_v3 = vld [vmem:[%s4169_s0 + $0x10] sm:$0xff]  }
   0x2   :  { %v2712_v1 = vld [vmem:[%s4169_s0] sm:$0xff]   ;;  %2564 = vmatprep.subr.bf16.mxu0 %v2711_v0  ;;  %1212 = vxpose.xlu1.c.b16.start [1/2] (short) (narrow) %v2714_v3, 16  ;;  %v2715_v4 = vld [vmem:[%s4169_s0 + $0x18] sm:$0xff]   ;;  %v2717_v6 = vld [vmem:[%s4169_s0 + $0x28] sm:$0xff]  }
   0x3   :  { %2565 = vmatpush3.bf16.msra.mxu0 %v2711_v0  ;;  %2566 = vmatprep.mubr.msk.bf16.mxu0 %vm160_vm0, %v2712_v1  ;;  %v2716_v5 = vld [vmem:[%s4169_s0 + $0x20] sm:$0xff]   ;;  %v3048_v7 = vld [vmem:[%s4169_s0 + $0x30] sm:$0xff]  }
   0x4   :  { %1149 = vxpose.xlu0.c.b16.start [1/2] (short) (narrow) %v2712_v1, 16 }
   0x6   :  { %2567 = vmatmul.mubr.msk.bf16.vlgmr.msra.gmra.mrb[0].mxu0 %vm160_vm0, %v2713_v2  ;;  %1213 = vxpose.xlu1.c.b16.end [2/2] (short) (narrow) %v2715_v4, 16 }
   0x7   :  { %2570 = vmatprep.mubr.msk.bf16.mxu0 %vm160_vm0, %v2714_v3 }
   0x8   :  { %1150 = vxpose.xlu0.c.b16.end [2/2] (short) (narrow) %v2713_v2, 16 }
   0xc   :  { %1274 = vxpose.xlu0.c.b16.start [1/2] (short) (narrow) %v2716_v5, 16 }
   0xe   :  { %2571 = vmatmul.mubr.msk.bf16.gmra.mrb[4].mxu0 %vm160_vm0, %v2715_v4 }
   0xf   :  { %2574 = vmatprep.mubr.msk.bf16.mxu0 %vm160_vm0, %v2716_v5 }
  0x10   :  { %1275 = vxpose.xlu0.c.b16.end [2/2] (short) (narrow) %v2717_v6, 16 }
  0x16   :  { %2575 = vmatmul.mubr.msk.bf16.gmra.mrb[8].mxu0 %vm160_vm0, %v2717_v6 }
  0x17   :  { %2578 = vmatprep.mubr.msk.bf16.mxu0 %vm160_vm0, %v3048_v7 }
  0x18   :  { %16 = vsyncpa [#allocation3], 0  ;;  %v3056_v8 = vld [vmem:[%s4169_s0 + $0x38] sm:$0xff]   ;;  %v3061_v9 = vld [vmem:[%s4169_s0 + $0x40] sm:$0xff]   ;;  %vm370_vm1 = vcmask 64512   ;;  %vm2939_vm2 = vmmov 0  }
  0x19   :  { %v3070_v10 = vld [vmem:[%s4169_s0 + $0x48] sm:$0xff]   ;;  %v2722_v11 = vld [vmem:[%s4169_s0 + $0x50] sm:$0xff]   ;;  %v2723_v12 = vld [vmem:[%s4169_s0 + $0x58] sm:$0xff]   ;;  %vm1165_vm3 = vcmask 261120   ;;  %s2942_s17 = smov 32   ;;  %s2943_s20 = smov 8  }
  0x1a   :  { %v2724_v13 = vld [vmem:[%s4169_s0 + $0x60] sm:$0xff]   ;;  %v2725_v14 = vld [vmem:[%s4169_s0 + $0x68] sm:$0xff]   ;;  %v2726_v15 = vld [vmem:[%s4169_s0 + $0x70] sm:$0xff]   ;;  %s2944_s21 = smov 64   ;;  %s2945_s22 = smov 40   ;;  %vm2158_vm4 = vcmask 195584  }
  0x1b   :  { %v2727_v16 = vld [vmem:[%s4169_s0 + $0x78] sm:$0xff]   ;;  %s2947_s23 = smov 16   ;;  %s2948_s24 = smov 72   ;;  %vm2163_vm5 = vcmask 326656   ;;  %vm2166_vm6 = vcmask 392192   ;;  %vm2169_vm7 = vcmask 457728  }
  0x1c   :  { %s2949_s25 = smov 48   ;;  %s2950_s26 = smov 104   ;;  %vm2172_vm8 = vcmask 523264   ;;  %vm2175_vm9 = vcmask 588800   ;;  %vm2178_vm10 = vcmask 654336   ;;  %vm2181_vm11 = vcmask 719872  }
  0x1d   :  { %s2952_s27 = smov 56   ;;  %s2953_s28 = smov 80   ;;  %vm2184_vm12 = vcmask 785408   ;;  %vm2187_vm13 = vcmask 850944   ;;  %vm2190_vm14 = vcmask 916480   ;;  %vm2193_vm15 = vcmask 982016  }
  0x1e   :  { %2579 = vmatmul.mubr.msk.bf16.gmra.mrb[12].mxu0 %vm160_vm0, %v3056_v8  ;;  %s2954_s29 = smov 88   ;;  %s2956_s30 = smov 120  }
  0x1f   :  { %2582 = vmatprep.mubr.msk.bf16.mxu0 %vm160_vm0, %v3061_v9  ;;  %s2957_s12 = smov 112  }
  0x26   :  { %2583 = vmatmul.mubr.msk.bf16.gmra.mrb[16].mxu0 %vm160_vm0, %v3070_v10 }
  0x27   :  { %2586 = vmatprep.mubr.msk.bf16.mxu0 %vm160_vm0, %v2722_v11 }
  0x2e   :  { %2587 = vmatmul.mubr.msk.bf16.gmra.mrb[20].mxu0 %vm160_vm0, %v2723_v12 }
  0x2f   :  { %2590 = vmatprep.mubr.msk.bf16.mxu0 %vm160_vm0, %v2724_v13 }
  0x36   :  { %2591 = vmatmul.mubr.msk.bf16.gmra.mrb[24].mxu0 %vm160_vm0, %v2725_v14 }
  0x37   :  { %2594 = vmatprep.mubr.msk.bf16.mxu0 %vm160_vm0, %v2726_v15 }
  0x3e   :  { %2595 = vmatmul.mubr.msk.bf16.gmra.mrb[28].mxu0 %vm160_vm0, %v2727_v16 }
  0xd9   :  { %v3098_v17 = vpop.f32.mrb[0].mxu0 }
  0xda   :  { %v3100_v18 = vpop.f32.mrb[1].mxu0  ;;  %v374_v24 = vsel %vm370_vm1, %v3098_v17, 0.0 }
  0xdb   :  { %v3102_v19 = vpop.f32.mrb[2].mxu0  ;;  %v371_v21 = vsel %vm370_vm1, %v3100_v18, 0.0 }
  0xdc   :  { %v3104_v20 = vpop.f32.mrb[3].mxu0  ;;  %v376_v26 = vsel %vm370_vm1, %v3102_v19, 0.0 }
  0xdd   :  { %v372_v22 = vsel %vm370_vm1, %v3104_v20, 0.0 }
  0xde   :  { %v373_v23 = vadd.f32 %v372_v22, %v371_v21 }
  0xe0   :  { %v375_v25 = vadd.f32 %v374_v24, %v373_v23 }
  0xe1   :  { %v3114_v27 = vpop.f32.mrb[4].mxu0 }
  0xe2   :  { %v3116_v28 = vpop.f32.mrb[5].mxu0  ;;  %v377_v29 = vadd.f32 %v376_v26, %v375_v25  ;;  %v382_v36 = vsel %vm370_vm1, %v3114_v27, 0.0 }
  0xe3   :  { %v378_v30 = vsel %vm370_vm1, %v3116_v28, 0.0  ;;  %v3120_v31 = vpop.f32.mrb[6].mxu0 }
  0xe4   :  { %v379_v32 = vadd.f32 %v378_v30, %v377_v29  ;;  %v3122_v33 = vpop.f32.mrb[7].mxu0  ;;  %v384_v38 = vsel %vm370_vm1, %v3120_v31, 0.0 }
  0xe5   :  { %v380_v34 = vsel %vm370_vm1, %v3122_v33, 0.0 }
  0xe6   :  { %v381_v35 = vadd.f32 %v380_v34, %v379_v32 }
  0xe8   :  { %v383_v37 = vadd.f32 %v382_v36, %v381_v35 }
  0xe9   :  { %v3130_v39 = vpop.f32.mrb[8].mxu0 }
  0xea   :  { %v3132_v40 = vpop.f32.mrb[9].mxu0  ;;  %v385_v41 = vadd.f32 %v384_v38, %v383_v37  ;;  %v390_v48 = vsel %vm370_vm1, %v3130_v39, 0.0 }
  0xeb   :  { %v386_v42 = vsel %vm370_vm1, %v3132_v40, 0.0  ;;  %v3136_v43 = vpop.f32.mrb[10].mxu0 }
  0xec   :  { %v387_v44 = vadd.f32 %v386_v42, %v385_v41  ;;  %v3138_v45 = vpop.f32.mrb[11].mxu0  ;;  %v392_v50 = vsel %vm370_vm1, %v3136_v43, 0.0 }
  0xed   :  { %v388_v46 = vsel %vm370_vm1, %v3138_v45, 0.0 }
  0xee   :  { %v389_v47 = vadd.f32 %v388_v46, %v387_v44 }
  0xf0   :  { %v391_v49 = vadd.f32 %v390_v48, %v389_v47 }
  0xf1   :  { %v3146_v51 = vpop.f32.mrb[12].mxu0 }
  0xf2   :  { %v3148_v52 = vpop.f32.mrb[13].mxu0  ;;  %v393_v53 = vadd.f32 %v392_v50, %v391_v49  ;;  %v398_v60 = vsel %vm370_vm1, %v3146_v51, 0.0 }
  0xf3   :  { %v394_v54 = vsel %vm370_vm1, %v3148_v52, 0.0  ;;  %v3152_v55 = vpop.f32.mrb[14].mxu0 }
  0xf4   :  { %v395_v56 = vadd.f32 %v394_v54, %v393_v53  ;;  %v3154_v57 = vpop.f32.mrb[15].mxu0  ;;  %v400_v62 = vsel %vm370_vm1, %v3152_v55, 0.0 }
  0xf5   :  { %v396_v58 = vsel %vm370_vm1, %v3154_v57, 0.0 }
  0xf6   :  { %v397_v59 = vadd.f32 %v396_v58, %v395_v56 }
  0xf8   :  { %v399_v61 = vadd.f32 %v398_v60, %v397_v59 }
  0xf9   :  { %v3162_v63 = vpop.f32.mrb[16].mxu0 }
  0xfa   :  { %v3164_v0 = vpop.f32.mrb[17].mxu0  ;;  %v401_v1 = vadd.f32 %v400_v62, %v399_v61  ;;  %v406_v12 = vsel %vm370_vm1, %v3162_v63, 0.0 }
  0xfb   :  { %v402_v2 = vsel %vm370_vm1, %v3164_v0, 0.0  ;;  %v3168_v3 = vpop.f32.mrb[18].mxu0 }
  0xfc   :  { %v403_v4 = vadd.f32 %v402_v2, %v401_v1  ;;  %v3170_v5 = vpop.f32.mrb[19].mxu0  ;;  %v408_v14 = vsel %vm370_vm1, %v3168_v3, 0.0 }
  0xfd   :  { %v404_v6 = vsel %vm370_vm1, %v3170_v5, 0.0 }
  0xfe   :  { %v405_v11 = vadd.f32 %v404_v6, %v403_v4 }
 0x100   :  { %v407_v13 = vadd.f32 %v406_v12, %v405_v11 }
 0x101   :  { %v3178_v15 = vpop.f32.mrb[20].mxu0 }
 0x102   :  { %v3180_v16 = vpop.f32.mrb[21].mxu0  ;;  %v409_v21 = vadd.f32 %v408_v14, %v407_v13  ;;  %v414_v30 = vsel %vm370_vm1, %v3178_v15, 0.0 }
 0x103   :  { %v410_v22 = vsel %vm370_vm1, %v3180_v16, 0.0  ;;  %v3184_v23 = vpop.f32.mrb[22].mxu0 }
 0x104   :  { %v411_v24 = vadd.f32 %v410_v22, %v409_v21  ;;  %v3186_v25 = vpop.f32.mrb[23].mxu0  ;;  %v416_v34 = vsel %vm370_vm1, %v3184_v23, 0.0 }
 0x105   :  { %v412_v26 = vsel %vm370_vm1, %v3186_v25, 0.0 }
 0x106   :  { %v413_v29 = vadd.f32 %v412_v26, %v411_v24 }
 0x108   :  { %v415_v32 = vadd.f32 %v414_v30, %v413_v29 }
 0x109   :  { %v3194_v35 = vpop.f32.mrb[24].mxu0 }
 0x10a   :  { %v3196_v36 = vpop.f32.mrb[25].mxu0  ;;  %v417_v37 = vadd.f32 %v416_v34, %v415_v32  ;;  %v422_v48 = vsel %vm370_vm1, %v3194_v35, 0.0 }
 0x10b   :  { %v418_v38 = vsel %vm370_vm1, %v3196_v36, 0.0  ;;  %v3200_v41 = vpop.f32.mrb[26].mxu0 }
 0x10c   :  { %v419_v42 = vadd.f32 %v418_v38, %v417_v37  ;;  %v3202_v44 = vpop.f32.mrb[27].mxu0  ;;  %v424_v50 = vsel %vm370_vm1, %v3200_v41, 0.0 }
 0x10d   :  { %v420_v46 = vsel %vm370_vm1, %v3202_v44, 0.0 }
 0x10e   :  { %v421_v47 = vadd.f32 %v420_v46, %v419_v42 }
 0x110   :  { %v423_v49 = vadd.f32 %v422_v48, %v421_v47 }
 0x111   :  { %v3210_v53 = vpop.f32.mrb[28].mxu0 }
 0x112   :  { %v3212_v54 = vpop.f32.mrb[29].mxu0  ;;  %v425_v56 = vadd.f32 %v424_v50, %v423_v49  ;;  %v430_v2 = vsel %vm370_vm1, %v3210_v53, 0.0 }
 0x113   :  { %v426_v58 = vsel %vm370_vm1, %v3212_v54, 0.0  ;;  %v3216_v59 = vpop.f32.mrb[30].mxu0 }
 0x114   :  { %v427_v60 = vadd.f32 %v426_v58, %v425_v56  ;;  %v3218_v61 = vpop.f32.mrb[31].mxu0  ;;  %v432_v6 = vsel %vm370_vm1, %v3216_v59, 0.0 }
 0x115   :  { %v428_v62 = vsel %vm370_vm1, %v3218_v61, 0.0 }
 0x116   :  { %v429_v1 = vadd.f32 %v428_v62, %v427_v60 }
 0x118   :  { %v431_v4 = vadd.f32 %v430_v2, %v429_v1 }
 0x11a   :  { %v433_v11 = vadd.f32 %v432_v6, %v431_v4 }
 0x11c   :  { %v434_v12 = vrot.slane %v433_v11, 4 }
 0x11e   :  { %v435_v13 = vadd.f32 %v434_v12, %v433_v11 }
 0x120   :  { %v436_v14 = vrot.slane %v435_v13, 2 }
 0x122   :  { %v437_v21 = vadd.f32 %v436_v14, %v435_v13 }
 0x124   :  { %v438_v22 = vrot.slane %v437_v21, 1 }
 0x126   :  { %v439_v24 = vadd.f32 %v438_v22, %v437_v21 }
 0x128   :  { %v3226_v26 = vmul.f32 0.00390625, %v439_v24 }
 0x12a   :  { %v442_v29 = vsub.f32 %v3100_v18, %v3226_v26  ;;  %v443_v30 = vsub.f32 %v3104_v20, %v3226_v26  ;;  %v444_v32 = vsub.f32 %v3098_v17, %v3226_v26  ;;  %v445_v34 = vsub.f32 %v3102_v19, %v3226_v26 }
 0x12b   :  { %v446_v42 = vsub.f32 %v3116_v28, %v3226_v26  ;;  %v447_v47 = vsub.f32 %v3122_v33, %v3226_v26  ;;  %v448_v58 = vsub.f32 %v3114_v27, %v3226_v26  ;;  %v449_v2 = vsub.f32 %v3120_v31, %v3226_v26 }
 0x12c   :  { %v474_v37 = vmul.f32 %v442_v29, %v442_v29  ;;  %v475_v38 = vmul.f32 %v443_v30, %v443_v30  ;;  %v476_v46 = vmul.f32 %v444_v32, %v444_v32  ;;  %v477_v48 = vmul.f32 %v445_v34, %v445_v34 }
 0x12d   :  { %v478_v60 = vmul.f32 %v446_v42, %v446_v42  ;;  %v479_v4 = vmul.f32 %v447_v47, %v447_v47  ;;  %v450_v12 = vsub.f32 %v3132_v40, %v3226_v26  ;;  %v480_v13 = vmul.f32 %v448_v58, %v448_v58 }
 0x12e   :  { %v506_v49 = vsel %vm370_vm1, %v474_v37, 0.0  ;;  %v507_v50 = vsel %vm370_vm1, %v475_v38, 0.0  ;;  %v509_v62 = vsel %vm370_vm1, %v476_v46, 0.0  ;;  %v511_v6 = vsel %vm370_vm1, %v477_v48, 0.0 }
 0x12f   :  { %v508_v56 = vadd.f32 %v507_v50, %v506_v49  ;;  %v513_v14 = vsel %vm370_vm1, %v478_v60, 0.0  ;;  %v451_v22 = vsub.f32 %v3138_v45, %v3226_v26  ;;  %v481_v24 = vmul.f32 %v449_v2, %v449_v2 }
 0x130   :  { %v515_v29 = vsel %vm370_vm1, %v479_v4, 0.0  ;;  %v452_v32 = vsub.f32 %v3130_v39, %v3226_v26  ;;  %v482_v34 = vmul.f32 %v450_v12, %v450_v12  ;;  %v517_v37 = vsel %vm370_vm1, %v480_v13, 0.0 }
 0x131   :  { %v510_v1 = vadd.f32 %v509_v62, %v508_v56  ;;  %v453_v42 = vsub.f32 %v3136_v43, %v3226_v26  ;;  %v483_v46 = vmul.f32 %v451_v22, %v451_v22  ;;  %v519_v47 = vsel %vm370_vm1, %v481_v24, 0.0 }
 0x132   :  { %v454_v49 = vsub.f32 %v3148_v52, %v3226_v26  ;;  %v484_v50 = vmul.f32 %v452_v32, %v452_v32  ;;  %v521_v56 = vsel %vm370_vm1, %v482_v34, 0.0  ;;  %v455_v60 = vsub.f32 %v3154_v57, %v3226_v26 }
 0x133   :  { %v512_v11 = vadd.f32 %v511_v6, %v510_v1  ;;  %v485_v62 = vmul.f32 %v453_v42, %v453_v42  ;;  %v523_v1 = vsel %vm370_vm1, %v483_v46, 0.0  ;;  %v456_v4 = vsub.f32 %v3146_v51, %v3226_v26 }
 0x134   :  { %v486_v6 = vmul.f32 %v454_v49, %v454_v49  ;;  %v457_v13 = vsub.f32 %v3152_v55, %v3226_v26  ;;  %v458_v24 = vsub.f32 %v3164_v0, %v3226_v26  ;;  %v459_v34 = vsub.f32 %v3170_v5, %v3226_v26 }
 0x135   :  { %v514_v21 = vadd.f32 %v513_v14, %v512_v11  ;;  %v525_v11 = vsel %vm370_vm1, %v484_v50, 0.0  ;;  %v487_v14 = vmul.f32 %v455_v60, %v455_v60  ;;  %v460_v46 = vsub.f32 %v3162_v63, %v3226_v26 }
 0x136   :  { %v461_v50 = vsub.f32 %v3168_v3, %v3226_v26 }
 0x137   :  { %v516_v30 = vadd.f32 %v515_v29, %v514_v21  ;;  %v527_v21 = vsel %vm370_vm1, %v485_v62, 0.0  ;;  %v488_v29 = vmul.f32 %v456_v4, %v456_v4  ;;  %v462_v62 = vsub.f32 %v3180_v16, %v3226_v26 }
 0x139   :  { %v518_v38 = vadd.f32 %v517_v37, %v516_v30  ;;  %v529_v30 = vsel %vm370_vm1, %v486_v6, 0.0  ;;  %v489_v37 = vmul.f32 %v457_v13, %v457_v13  ;;  %v463_v6 = vsub.f32 %v3186_v25, %v3226_v26 }
 0x13b   :  { %v520_v48 = vadd.f32 %v519_v47, %v518_v38  ;;  %v531_v38 = vsel %vm370_vm1, %v487_v14, 0.0  ;;  %v490_v47 = vmul.f32 %v458_v24, %v458_v24  ;;  %v464_v14 = vsub.f32 %v3178_v15, %v3226_v26 }
 0x13d   :  { %v522_v58 = vadd.f32 %v521_v56, %v520_v48  ;;  %v533_v48 = vsel %vm370_vm1, %v488_v29, 0.0  ;;  %v491_v56 = vmul.f32 %v459_v34, %v459_v34  ;;  %v465_v29 = vsub.f32 %v3184_v23, %v3226_v26 }
 0x13f   :  { %v524_v2 = vadd.f32 %v523_v1, %v522_v58  ;;  %v535_v58 = vsel %vm370_vm1, %v489_v37, 0.0  ;;  %v492_v1 = vmul.f32 %v460_v46, %v460_v46  ;;  %v466_v37 = vsub.f32 %v3196_v36, %v3226_v26 }
 0x141   :  { %v526_v12 = vadd.f32 %v525_v11, %v524_v2  ;;  %v537_v2 = vsel %vm370_vm1, %v490_v47, 0.0  ;;  %v493_v11 = vmul.f32 %v461_v50, %v461_v50  ;;  %v467_v47 = vsub.f32 %v3202_v44, %v3226_v26 }
 0x143   :  { %v528_v22 = vadd.f32 %v527_v21, %v526_v12  ;;  %v539_v12 = vsel %vm370_vm1, %v491_v56, 0.0  ;;  %v494_v21 = vmul.f32 %v462_v62, %v462_v62  ;;  %v468_v56 = vsub.f32 %v3194_v35, %v3226_v26 }
 0x145   :  { %v530_v32 = vadd.f32 %v529_v30, %v528_v22  ;;  %v541_v22 = vsel %vm370_vm1, %v492_v1, 0.0  ;;  %v495_v30 = vmul.f32 %v463_v6, %v463_v6  ;;  %v469_v1 = vsub.f32 %v3200_v41, %v3226_v26 }
 0x147   :  { %v532_v42 = vadd.f32 %v531_v38, %v530_v32  ;;  %v543_v32 = vsel %vm370_vm1, %v493_v11, 0.0  ;;  %v496_v38 = vmul.f32 %v464_v14, %v464_v14  ;;  %v470_v11 = vsub.f32 %v3212_v54, %v3226_v26 }
 0x149   :  { %v534_v49 = vadd.f32 %v533_v48, %v532_v42  ;;  %v545_v42 = vsel %vm370_vm1, %v494_v21, 0.0  ;;  %v497_v48 = vmul.f32 %v465_v29, %v465_v29  ;;  %v471_v21 = vsub.f32 %v3218_v61, %v3226_v26 }
 0x14b   :  { %v536_v60 = vadd.f32 %v535_v58, %v534_v49  ;;  %v547_v49 = vsel %vm370_vm1, %v495_v30, 0.0  ;;  %v498_v58 = vmul.f32 %v466_v37, %v466_v37  ;;  %v472_v30 = vsub.f32 %v3210_v53, %v3226_v26 }
 0x14d   :  { %v538_v4 = vadd.f32 %v537_v2, %v536_v60  ;;  %v549_v60 = vsel %vm370_vm1, %v496_v38, 0.0  ;;  %v499_v2 = vmul.f32 %v467_v47, %v467_v47  ;;  %v473_v38 = vsub.f32 %v3216_v59, %v3226_v26 }
 0x14f   :  { %v540_v13 = vadd.f32 %v539_v12, %v538_v4  ;;  %v551_v4 = vsel %vm370_vm1, %v497_v48, 0.0  ;;  %v500_v12 = vmul.f32 %v468_v56, %v468_v56  ;;  %v504_v48 = vmul.f32 %v472_v30, %v472_v30 }
 0x150   :  { %v505_v56 = vmul.f32 %v473_v38, %v473_v38 }
 0x151   :  { %v542_v24 = vadd.f32 %v541_v22, %v540_v13  ;;  %v553_v13 = vsel %vm370_vm1, %v498_v58, 0.0  ;;  %v501_v22 = vmul.f32 %v469_v1, %v469_v1 }
 0x153   :  { %v544_v34 = vadd.f32 %v543_v32, %v542_v24  ;;  %v555_v24 = vsel %vm370_vm1, %v499_v2, 0.0  ;;  %v502_v32 = vmul.f32 %v470_v11, %v470_v11  ;;  %v567_v2 = vsel %vm370_vm1, %v505_v56, 0.0 }
 0x155   :  { %v546_v46 = vadd.f32 %v545_v42, %v544_v34  ;;  %v557_v34 = vsel %vm370_vm1, %v500_v12, 0.0  ;;  %v503_v42 = vmul.f32 %v471_v21, %v471_v21 }
 0x157   :  { %v548_v50 = vadd.f32 %v547_v49, %v546_v46  ;;  %v559_v46 = vsel %vm370_vm1, %v501_v22, 0.0  ;;  %v561_v49 = vsel %vm370_vm1, %v502_v32, 0.0  ;;  %v563_v58 = vsel %vm370_vm1, %v503_v42, 0.0  ;;  %v578_v32 = vld [vmem:[%s4172_s3] sm:$0x1] }
 0x158   :  { %v616_v42 = vld [vmem:[%s4173_s4] sm:$0x1] }
 0x159   :  { %v550_v62 = vadd.f32 %v549_v60, %v548_v50 }
 0x15b   :  { %v552_v6 = vadd.f32 %v551_v4, %v550_v62  ;;  %v565_v62 = vsel %vm370_vm1, %v504_v48, 0.0 }
 0x15d   :  { %v554_v14 = vadd.f32 %v553_v13, %v552_v6 }
 0x15f   :  { %v556_v29 = vadd.f32 %v555_v24, %v554_v14 }
 0x161   :  { %v558_v37 = vadd.f32 %v557_v34, %v556_v29  ;;  %v580_v29 = vlaneseq }
 0x163   :  { %v560_v47 = vadd.f32 %v559_v46, %v558_v37  ;;  %v3324_v30 = vshrl.u32 %v580_v29, 7 }
 0x165   :  { %v562_v50 = vadd.f32 %v561_v49, %v560_v47  ;;  %v3330_v34 = vsub.s32 0, %v3324_v30 }
 0x167   :  { %v564_v60 = vadd.f32 %v563_v58, %v562_v50 }
 0x169   :  { %v566_v1 = vadd.f32 %v565_v62, %v564_v60 }
 0x16b   :  { %v568_v4 = vadd.f32 %v567_v2, %v566_v1 }
 0x16d   :  { %v569_v6 = vrot.slane %v568_v4, 4 }
 0x16f   :  { %v570_v11 = vadd.f32 %v569_v6, %v568_v4 }
 0x171   :  { %v571_v12 = vrot.slane %v570_v11, 2 }
 0x173   :  { %v572_v13 = vadd.f32 %v571_v12, %v570_v11 }
 0x175   :  { %v573_v14 = vrot.slane %v572_v13, 1 }
 0x177   :  { %v574_v21 = vadd.f32 %v573_v14, %v572_v13 }
 0x179   :  { %v575_v22 = vmul.f32 0.00390625, %v574_v21 }
 0x17b   :  { %v576_v24 = vadd.f32 1e-05, %v575_v22 }
 0x17d   :  { %2738 = vrsqrt.f32 %v576_v24 }
 0x187   :  { %v2739_v37 = vpop.eup %2738 }
 0x188   :  { %v579_v38 = vmul.f32 %v2739_v37, %v578_v32 }
 0x18a   :  { %v583_v46 = vrot.slane %v579_v38, %v3330_v34  ;;  %v617_v47 = vmul.f32 %v579_v38, %v3226_v26 }
 0x18c   :  { %v3338_v48 = vmul.f32 %v583_v46, %v3218_v61  ;;  %v618_v49 = vsub.f32 %v616_v42, %v617_v47  ;;  %v584_v50 = vmul.f32 %v583_v46, %v3100_v18  ;;  %v585_v56 = vmul.f32 %v583_v46, %v3104_v20 }
 0x18d   :  { %v586_v58 = vmul.f32 %v3098_v17, %v583_v46  ;;  %v587_v60 = vmul.f32 %v3102_v19, %v583_v46  ;;  %v588_v62 = vmul.f32 %v583_v46, %v3116_v28  ;;  %v589_v1 = vmul.f32 %v583_v46, %v3122_v33 }
 0x18e   :  { %v3347_v2 = vrot.slane %v618_v49, %v3330_v34  ;;  %v590_v26 = vmul.f32 %v3114_v27, %v583_v46  ;;  %v591_v61 = vmul.f32 %v3120_v31, %v583_v46  ;;  %v592_v4 = vmul.f32 %v583_v46, %v3132_v40 }
 0x18f   :  { %v593_v18 = vmul.f32 %v583_v46, %v3138_v45  ;;  %v594_v20 = vmul.f32 %v3130_v39, %v583_v46  ;;  %v595_v17 = vmul.f32 %v3136_v43, %v583_v46  ;;  %v596_v19 = vmul.f32 %v583_v46, %v3148_v52 }
 0x190   :  { %v597_v28 = vmul.f32 %v583_v46, %v3154_v57  ;;  %v598_v33 = vmul.f32 %v3146_v51, %v583_v46  ;;  %v599_v6 = vmul.f32 %v3152_v55, %v583_v46  ;;  %v600_v27 = vmul.f32 %v583_v46, %v3164_v0 }
 0x191   :  { %v601_v31 = vmul.f32 %v583_v46, %v3170_v5  ;;  %v602_v40 = vmul.f32 %v3162_v63, %v583_v46  ;;  %v603_v45 = vmul.f32 %v3168_v3, %v583_v46  ;;  %v604_v39 = vmul.f32 %v583_v46, %v3180_v16 }
 0x192   :  { %v605_v43 = vmul.f32 %v583_v46, %v3186_v25  ;;  %v606_v52 = vmul.f32 %v3178_v15, %v583_v46  ;;  %v607_v57 = vmul.f32 %v3184_v23, %v583_v46  ;;  %v608_v51 = vmul.f32 %v583_v46, %v3196_v36 }
 0x193   :  { %v609_v55 = vmul.f32 %v583_v46, %v3202_v44  ;;  %v610_v0 = vmul.f32 %v3194_v35, %v583_v46  ;;  %v611_v5 = vmul.f32 %v3200_v41, %v583_v46  ;;  %v612_v63 = vmul.f32 %v583_v46, %v3212_v54 }
 0x194   :  { %v614_v3 = vmul.f32 %v3210_v53, %v583_v46  ;;  %v615_v16 = vmul.f32 %v3216_v59, %v583_v46  ;;  %v3375_v25 = vadd.f32 %v3347_v2, %v586_v58  ;;  %v3378_v15 = vadd.f32 %v3347_v2, %v584_v50 }
 0x195   :  { %v3381_v23 = vadd.f32 %v3347_v2, %v587_v60  ;;  %v3384_v36 = vadd.f32 %v3347_v2, %v585_v56  ;;  %v3387_v35 = vadd.f32 %v3347_v2, %v589_v1  ;;  %v3390_v41 = vadd.f32 %v3347_v2, %v588_v62 }
 0x196   :  { %v663_v44 = vsel %vm370_vm1, %v3375_v25, -inf  ;;  %v657_v53 = vsel %vm370_vm1, %v3378_v15, -inf  ;;  %v3397_v54 = vadd.f32 %v3347_v2, %v591_v61  ;;  %v3400_v59 = vadd.f32 %v3347_v2, %v590_v26 }
 0x197   :  { %664 = vmax.xlane.f32.xlu1 %v663_v44  ;;  %658 = vmax.xlane.f32.xlu0 %v657_v53  ;;  %v3403_v11 = vadd.f32 %v3347_v2, %v593_v18  ;;  %v3406_v12 = vadd.f32 %v3347_v2, %v592_v4  ;;  %v3409_v13 = vadd.f32 %v3347_v2, %v595_v17  ;;  %v666_v24 = vsel %vm370_vm1, %v3381_v23, -inf }
 0x198   :  { %v3412_v14 = vadd.f32 %v3347_v2, %v594_v20  ;;  %v3415_v21 = vadd.f32 %v3347_v2, %v597_v28  ;;  %v3418_v22 = vadd.f32 %v3347_v2, %v596_v19  ;;  %v660_v29 = vsel %vm370_vm1, %v3384_v36, -inf }
 0x199   :  { %v3425_v32 = vadd.f32 %v3347_v2, %v599_v6  ;;  %v3428_v37 = vadd.f32 %v3347_v2, %v598_v33  ;;  %v3431_v38 = vadd.f32 %v3347_v2, %v601_v31  ;;  %v3434_v42 = vadd.f32 %v3347_v2, %v600_v27 }
 0x19a   :  { %v3437_v46 = vadd.f32 %v3347_v2, %v603_v45  ;;  %v3440_v47 = vadd.f32 %v3347_v2, %v602_v40  ;;  %v3443_v49 = vadd.f32 %v3347_v2, %v605_v43  ;;  %v3446_v50 = vadd.f32 %v3347_v2, %v604_v39 }
 0x19b   :  { %667 = vmax.xlane.f32.xlu1 %v666_v24  ;;  %661 = vmax.xlane.f32.xlu0 %v660_v29  ;;  %v672_v56 = vsel %vm370_vm1, %v3387_v35, -inf  ;;  %v669_v58 = vsel %vm370_vm1, %v3390_v41, -inf  ;;  %v3453_v60 = vadd.f32 %v3347_v2, %v607_v57  ;;  %v3456_v62 = vadd.f32 %v3347_v2, %v606_v52 }
 0x19c   :  { %v3459_v1 = vadd.f32 %v3347_v2, %v609_v55  ;;  %v3462_v26 = vadd.f32 %v3347_v2, %v608_v51  ;;  %v3465_v61 = vadd.f32 %v3347_v2, %v611_v5  ;;  %v3468_v4 = vadd.f32 %v3347_v2, %v610_v0 }
 0x19d   :  { %v3472_v18 = vadd.f32 %v3347_v2, %v3338_v48  ;;  %v3475_v20 = vadd.f32 %v3347_v2, %v612_v63  ;;  %v678_v17 = vsel %vm370_vm1, %v3397_v54, -inf  ;;  %v675_v19 = vsel %vm370_vm1, %v3400_v59, -inf }
 0x19e   :  { %v3482_v28 = vadd.f32 %v3347_v2, %v615_v16  ;;  %v3485_v33 = vadd.f32 %v3347_v2, %v614_v3  ;;  %v684_v48 = vsel %vm370_vm1, %v3403_v11, -inf  ;;  %v681_v6 = vsel %vm370_vm1, %v3406_v12, -inf }
 0x19f   :  { %673 = vmax.xlane.f32.xlu1 %v672_v56  ;;  %670 = vmax.xlane.f32.xlu0 %v669_v58  ;;  %v690_v27 = vsel %vm370_vm1, %v3409_v13, -inf  ;;  %v687_v31 = vsel %vm370_vm1, %v3412_v14, -inf  ;;  %v696_v2 = vsel %vm370_vm1, %v3415_v21, -inf  ;;  %v693_v40 = vsel %vm370_vm1, %v3418_v22, -inf }
 0x1a0   :  { %v702_v45 = vsel %vm370_vm1, %v3425_v32, -inf  ;;  %v699_v39 = vsel %vm370_vm1, %v3428_v37, -inf  ;;  %v708_v43 = vsel %vm370_vm1, %v3431_v38, -inf  ;;  %v705_v52 = vsel %vm370_vm1, %v3434_v42, -inf }
 0x1a1   :  { %v714_v57 = vsel %vm370_vm1, %v3437_v46, -inf  ;;  %v711_v51 = vsel %vm370_vm1, %v3440_v47, -inf  ;;  %v720_v55 = vsel %vm370_vm1, %v3443_v49, -inf  ;;  %v717_v0 = vsel %vm370_vm1, %v3446_v50, -inf }
 0x1a2   :  { %v726_v5 = vsel %vm370_vm1, %v3453_v60, -inf  ;;  %v723_v63 = vsel %vm370_vm1, %v3456_v62, -inf  ;;  %v732_v3 = vsel %vm370_vm1, %v3459_v1, -inf  ;;  %v729_v16 = vsel %vm370_vm1, %v3462_v26, -inf }
 0x1a3   :  { %679 = vmax.xlane.f32.xlu1 %v678_v17  ;;  %676 = vmax.xlane.f32.xlu0 %v675_v19  ;;  %v738_v44 = vsel %vm370_vm1, %v3465_v61, -inf  ;;  %v735_v53 = vsel %vm370_vm1, %v3468_v4, -inf  ;;  %v744_v24 = vsel %vm370_vm1, %v3472_v18, -inf  ;;  %v741_v29 = vsel %vm370_vm1, %v3475_v20, -inf  ;;  %v3539_v17 = vpop.trf.xlu0  ;;  %v3541_v19 = vpop.trf.xlu1 }
 0x1a4   :  { %v750_v56 = vsel %vm370_vm1, %v3482_v28, -inf  ;;  %v747_v58 = vsel %vm370_vm1, %v3485_v33, -inf }
 0x1a7   :  { %685 = vmax.xlane.f32.xlu1 %v684_v48  ;;  %682 = vmax.xlane.f32.xlu0 %v681_v6  ;;  %v3543_v48 = vpop.trf.xlu0 }
 0x1ab   :  { %691 = vmax.xlane.f32.xlu1 %v690_v27  ;;  %688 = vmax.xlane.f32.xlu0 %v687_v31 }
 0x1af   :  { %697 = vmax.xlane.f32.xlu1 %v696_v2  ;;  %694 = vmax.xlane.f32.xlu0 %v693_v40 }
 0x1b3   :  { %703 = vmax.xlane.f32.xlu1 %v702_v45  ;;  %700 = vmax.xlane.f32.xlu0 %v699_v39 }
 0x1b7   :  { %709 = vmax.xlane.f32.xlu1 %v708_v43  ;;  %706 = vmax.xlane.f32.xlu0 %v705_v52 }
 0x1bb   :  { %715 = vmax.xlane.f32.xlu1 %v714_v57  ;;  %712 = vmax.xlane.f32.xlu0 %v711_v51 }
 0x1bf   :  { %721 = vmax.xlane.f32.xlu1 %v720_v55  ;;  %718 = vmax.xlane.f32.xlu0 %v717_v0 }
 0x1c3   :  { %727 = vmax.xlane.f32.xlu1 %v726_v5  ;;  %724 = vmax.xlane.f32.xlu0 %v723_v63 }
 0x1c7   :  { %733 = vmax.xlane.f32.xlu1 %v732_v3  ;;  %730 = vmax.xlane.f32.xlu0 %v729_v16 }
 0x1cb   :  { %739 = vmax.xlane.f32.xlu1 %v738_v44  ;;  %736 = vmax.xlane.f32.xlu0 %v735_v53 }
 0x1cf   :  { %745 = vmax.xlane.f32.xlu1 %v744_v24  ;;  %742 = vmax.xlane.f32.xlu0 %v741_v29 }
 0x1d3   :  { %751 = vmax.xlane.f32.xlu1 %v750_v56  ;;  %748 = vmax.xlane.f32.xlu0 %v747_v58 }
 0x200   :  { %1336 = vxpose.xlu0.c.b16.start [1/2] (short) (narrow) %v3048_v7, 16  ;;  %1398 = vxpose.xlu1.c.b16.start [1/2] (short) (narrow) %v3061_v9, 16 }
 0x204   :  { %1337 = vxpose.xlu0.c.b16.end [2/2] (short) (narrow) %v3056_v8, 16  ;;  %1399 = vxpose.xlu1.c.b16.end [2/2] (short) (narrow) %v3070_v10, 16 }
 0x224   :  { %v665_v6 = vpop.xlane.xlu1 %664  ;;  %v659_v27 = vpop.xlane.xlu0 %658 }
 0x225   :  { %v755_v31 = vsub.f32 %v3375_v25, %v665_v6  ;;  %v753_v2 = vsub.f32 %v3378_v15, %v659_v27 }
 0x227   :  { %v785_v40 = vmul.f32 1.442695, %v753_v2  ;;  %v789_v7 = vmul.f32 1.442695, %v755_v31 }
 0x228   :  { %v668_v45 = vpop.xlane.xlu1 %667  ;;  %v662_v9 = vpop.xlane.xlu0 %661 }
 0x229   :  { %v756_v8 = vsub.f32 %v3381_v23, %v668_v45  ;;  %v754_v10 = vsub.f32 %v3384_v36, %v662_v9  ;;  %2740 = vpow2.f32 %v785_v40 }
 0x22a   :  { %2742 = vpow2.f32 %v789_v7 }
 0x22b   :  { %v787_v39 = vmul.f32 1.442695, %v754_v10  ;;  %v791_v43 = vmul.f32 1.442695, %v756_v8 }
 0x22c   :  { %v674_v52 = vpop.xlane.xlu1 %673  ;;  %v671_v57 = vpop.xlane.xlu0 %670 }
 0x22d   :  { %v758_v51 = vsub.f32 %v3387_v35, %v674_v52  ;;  %v757_v25 = vsub.f32 %v3390_v41, %v671_v57  ;;  %2744 = vpow2.f32 %v787_v39 }
 0x22e   :  { %2746 = vpow2.f32 %v791_v43 }
 0x22f   :  { %v793_v15 = vmul.f32 1.442695, %v757_v25  ;;  %v795_v55 = vmul.f32 1.442695, %v758_v51 }
 0x230   :  { %v680_v0 = vpop.xlane.xlu1 %679  ;;  %v677_v5 = vpop.xlane.xlu0 %676 }
 0x231   :  { %v760_v23 = vsub.f32 %v3397_v54, %v680_v0  ;;  %v759_v36 = vsub.f32 %v3400_v59, %v677_v5  ;;  %2748 = vpow2.f32 %v793_v15 }
 0x232   :  { %2750 = vpow2.f32 %v795_v55 }
 0x233   :  { %v797_v63 = vmul.f32 1.442695, %v759_v36  ;;  %v3553_v3 = vpop.eup %2740  ;;  %v799_v16 = vmul.f32 1.442695, %v760_v23 }
 0x234   :  { %v686_v44 = vpop.xlane.xlu1 %685  ;;  %v683_v35 = vpop.xlane.xlu0 %682  ;;  %v849_v24 = vsel %vm370_vm1, %v3553_v3, 0.0 }
 0x235   :  { %v762_v41 = vsub.f32 %v3403_v11, %v686_v44  ;;  %v761_v53 = vsub.f32 %v3406_v12, %v683_v35  ;;  %v3559_v29 = vpop.eup %2742  ;;  %2752 = vpow2.f32 %v797_v63  ;;  %850 = vadd.xlane.f32.xlu0 %v849_v24 }
 0x236   :  { %2754 = vpow2.f32 %v799_v16  ;;  %v855_v12 = vsel %vm370_vm1, %v3559_v29, 0.0 }
 0x237   :  { %v801_v54 = vmul.f32 1.442695, %v761_v53  ;;  %v3561_v59 = vpop.eup %2744  ;;  %v803_v56 = vmul.f32 1.442695, %v762_v41 }
 0x238   :  { %v692_v58 = vpop.xlane.xlu1 %691  ;;  %v689_v6 = vpop.xlane.xlu0 %688  ;;  %v852_v31 = vsel %vm370_vm1, %v3561_v59, 0.0 }
 0x239   :  { %v764_v27 = vsub.f32 %v3409_v13, %v692_v58  ;;  %v763_v11 = vsub.f32 %v3412_v14, %v689_v6  ;;  %v3569_v2 = vpop.eup %2746  ;;  %2756 = vpow2.f32 %v801_v54  ;;  %856 = vadd.xlane.f32.xlu0 %v855_v12  ;;  %853 = vadd.xlane.f32.xlu1 %v852_v31 }
 0x23a   :  { %2758 = vpow2.f32 %v803_v56  ;;  %v858_v10 = vsel %vm370_vm1, %v3569_v2, 0.0 }
 0x23b   :  { %v805_v40 = vmul.f32 1.442695, %v763_v11  ;;  %v3571_v7 = vpop.eup %2748  ;;  %v807_v45 = vmul.f32 1.442695, %v764_v27 }
 0x23c   :  { %v698_v9 = vpop.xlane.xlu1 %697  ;;  %v695_v13 = vpop.xlane.xlu0 %694  ;;  %v861_v39 = vsel %vm370_vm1, %v3571_v7, 0.0 }
 0x23d   :  { %v766_v14 = vsub.f32 %v3415_v21, %v698_v9  ;;  %v765_v8 = vsub.f32 %v3418_v22, %v695_v13  ;;  %v3579_v43 = vpop.eup %2750  ;;  %2760 = vpow2.f32 %v805_v40  ;;  %859 = vadd.xlane.f32.xlu1 %v858_v10  ;;  %862 = vadd.xlane.f32.xlu0 %v861_v39 }
 0x23e   :  { %2762 = vpow2.f32 %v807_v45  ;;  %v864_v55 = vsel %vm370_vm1, %v3579_v43, 0.0 }
 0x23f   :  { %v809_v52 = vmul.f32 1.442695, %v765_v8  ;;  %v3581_v57 = vpop.eup %2752  ;;  %v811_v51 = vmul.f32 1.442695, %v766_v14 }
 0x240   :  { %v704_v25 = vpop.xlane.xlu1 %703  ;;  %v701_v21 = vpop.xlane.xlu0 %700  ;;  %v867_v0 = vsel %vm370_vm1, %v3581_v57, 0.0 }
 0x241   :  { %v768_v22 = vsub.f32 %v3425_v32, %v704_v25  ;;  %v767_v15 = vsub.f32 %v3428_v37, %v701_v21  ;;  %v3589_v5 = vpop.eup %2754  ;;  %2764 = vpow2.f32 %v809_v52  ;;  %865 = vadd.xlane.f32.xlu1 %v864_v55  ;;  %868 = vadd.xlane.f32.xlu0 %v867_v0 }
 0x242   :  { %2766 = vpow2.f32 %v811_v51  ;;  %v870_v35 = vsel %vm370_vm1, %v3589_v5, 0.0 }
 0x243   :  { %v813_v23 = vmul.f32 1.442695, %v767_v15  ;;  %v3591_v36 = vpop.eup %2756  ;;  %v815_v63 = vmul.f32 1.442695, %v768_v22 }
 0x244   :  { %v710_v16 = vpop.xlane.xlu1 %709  ;;  %v707_v32 = vpop.xlane.xlu0 %706  ;;  %v873_v41 = vsel %vm370_vm1, %v3591_v36, 0.0 }
 0x245   :  { %v770_v37 = vsub.f32 %v3431_v38, %v710_v16  ;;  %v769_v44 = vsub.f32 %v3434_v42, %v707_v32  ;;  %v3599_v53 = vpop.eup %2758  ;;  %2768 = vpow2.f32 %v813_v23  ;;  %871 = vadd.xlane.f32.xlu1 %v870_v35  ;;  %874 = vadd.xlane.f32.xlu0 %v873_v41 }
 0x246   :  { %2770 = vpow2.f32 %v815_v63  ;;  %v876_v27 = vsel %vm370_vm1, %v3599_v53, 0.0 }
 0x247   :  { %v817_v24 = vmul.f32 1.442695, %v769_v44  ;;  %v3601_v54 = vpop.eup %2760  ;;  %v819_v56 = vmul.f32 1.442695, %v770_v37 }
 0x248   :  { %v716_v58 = vpop.xlane.xlu1 %715  ;;  %v713_v38 = vpop.xlane.xlu0 %712  ;;  %v879_v11 = vsel %vm370_vm1, %v3601_v54, 0.0 }
 0x249   :  { %v772_v42 = vsub.f32 %v3437_v46, %v716_v58  ;;  %v771_v6 = vsub.f32 %v3440_v47, %v713_v38  ;;  %v3609_v12 = vpop.eup %2762  ;;  %2772 = vpow2.f32 %v817_v24  ;;  %877 = vadd.xlane.f32.xlu1 %v876_v27  ;;  %880 = vadd.xlane.f32.xlu0 %v879_v11  ;;  %v2938_v24 = vmov 0.0  }
 0x24a   :  { %2774 = vpow2.f32 %v819_v56  ;;  %v882_v14 = vsel %vm370_vm1, %v3609_v12, 0.0  ;;  %2598 = vmatprep.subr.bf16.mxu1 %v2938_v24  ;;  %2662 = vmatprep.subr.bf16.mxu0 %v2938_v24 }
 0x24b   :  { %v821_v31 = vmul.f32 1.442695, %v771_v6  ;;  %v3611_v40 = vpop.eup %2764  ;;  %v823_v45 = vmul.f32 1.442695, %v772_v42  ;;  %2602 = vmatprep.mubr.msk.bf16.mxu1 %vm2939_vm2, %v2938_v24  ;;  %2678 = vmatprep.mubr.msk.bf16.mxu0 %vm2939_vm2, %v2938_v24 }
 0x24c   :  { %v722_v9 = vpop.xlane.xlu1 %721  ;;  %v719_v46 = vpop.xlane.xlu0 %718  ;;  %v885_v8 = vsel %vm370_vm1, %v3611_v40, 0.0 }
 0x24d   :  { %v774_v47 = vsub.f32 %v3443_v49, %v722_v9  ;;  %v773_v13 = vsub.f32 %v3446_v50, %v719_v46  ;;  %v3619_v10 = vpop.eup %2766  ;;  %2776 = vpow2.f32 %v821_v31  ;;  %883 = vadd.xlane.f32.xlu1 %v882_v14  ;;  %886 = vadd.xlane.f32.xlu0 %v885_v8 }
 0x24e   :  { %2778 = vpow2.f32 %v823_v45  ;;  %v888_v22 = vsel %vm370_vm1, %v3619_v10, 0.0 }
 0x24f   :  { %v825_v39 = vmul.f32 1.442695, %v773_v13  ;;  %v3621_v52 = vpop.eup %2768  ;;  %v827_v51 = vmul.f32 1.442695, %v774_v47 }
 0x250   :  { %v728_v25 = vpop.xlane.xlu1 %727  ;;  %v725_v49 = vpop.xlane.xlu0 %724  ;;  %v891_v15 = vsel %vm370_vm1, %v3621_v52, 0.0 }
 0x251   :  { %v776_v50 = vsub.f32 %v3453_v60, %v728_v25  ;;  %v775_v21 = vsub.f32 %v3456_v62, %v725_v49  ;;  %v3629_v55 = vpop.eup %2770  ;;  %2780 = vpow2.f32 %v825_v39  ;;  %889 = vadd.xlane.f32.xlu1 %v888_v22  ;;  %892 = vadd.xlane.f32.xlu0 %v891_v15 }
 0x252   :  { %2782 = vpow2.f32 %v827_v51  ;;  %v894_v37 = vsel %vm370_vm1, %v3629_v55, 0.0 }
 0x253   :  { %v829_v0 = vmul.f32 1.442695, %v775_v21  ;;  %v3631_v23 = vpop.eup %2772  ;;  %v831_v63 = vmul.f32 1.442695, %v776_v50 }
 0x254   :  { %v734_v16 = vpop.xlane.xlu1 %733  ;;  %v731_v60 = vpop.xlane.xlu0 %730  ;;  %v897_v44 = vsel %vm370_vm1, %v3631_v23, 0.0 }
 0x255   :  { %v778_v62 = vsub.f32 %v3459_v1, %v734_v16  ;;  %v777_v32 = vsub.f32 %v3462_v26, %v731_v60  ;;  %v3639_v35 = vpop.eup %2774  ;;  %2784 = vpow2.f32 %v829_v0  ;;  %895 = vadd.xlane.f32.xlu1 %v894_v37  ;;  %898 = vadd.xlane.f32.xlu0 %v897_v44 }
 0x256   :  { %2786 = vpow2.f32 %v831_v63  ;;  %v900_v6 = vsel %vm370_vm1, %v3639_v35, 0.0 }
 0x257   :  { %v833_v41 = vmul.f32 1.442695, %v777_v32  ;;  %v3643_v1 = vpop.eup %2776  ;;  %v835_v26 = vmul.f32 1.442695, %v778_v62 }
 0x258   :  { %v740_v56 = vpop.xlane.xlu1 %739  ;;  %v737_v58 = vpop.xlane.xlu0 %736  ;;  %v903_v27 = vsel %vm370_vm1, %v3643_v1, 0.0 }
 0x259   :  { %v780_v38 = vsub.f32 %v3465_v61, %v740_v56  ;;  %v779_v42 = vsub.f32 %v3468_v4, %v737_v58  ;;  %v3651_v11 = vpop.eup %2778  ;;  %2788 = vpow2.f32 %v833_v41  ;;  %901 = vadd.xlane.f32.xlu1 %v900_v6  ;;  %904 = vadd.xlane.f32.xlu0 %v903_v27 }
 0x25a   :  { %2790 = vpow2.f32 %v835_v26  ;;  %v906_v13 = vsel %vm370_vm1, %v3651_v11, 0.0 }
 0x25b   :  { %v837_v31 = vmul.f32 1.442695, %v779_v42  ;;  %v3653_v45 = vpop.eup %2780  ;;  %v839_v9 = vmul.f32 1.442695, %v780_v38 }
 0x25c   :  { %v746_v46 = vpop.xlane.xlu1 %745  ;;  %v743_v61 = vpop.xlane.xlu0 %742  ;;  %v909_v14 = vsel %vm370_vm1, %v3653_v45, 0.0 }
 0x25d   :  { %v782_v4 = vsub.f32 %v3472_v18, %v746_v46  ;;  %v781_v47 = vsub.f32 %v3475_v20, %v743_v61  ;;  %v3661_v8 = vpop.eup %2782  ;;  %2792 = vpow2.f32 %v837_v31  ;;  %907 = vadd.xlane.f32.xlu1 %v906_v13  ;;  %910 = vadd.xlane.f32.xlu0 %v909_v14  ;;  %v2909_v46 = vld [vmem:[%s4169_s0 + $0x58] sm:$0xff]   ;;  %v2910_v61 = vld [vmem:[%s4169_s0 + $0x70] sm:$0xff]   ;;  %v2913_v13 = vld [vmem:[%s4169_s0 + $0x68] sm:$0xff]  }
 0x25e   :  { %2794 = vpow2.f32 %v839_v9  ;;  %v912_v50 = vsel %vm370_vm1, %v3661_v8, 0.0  ;;  %v2908_v9 = vld [vmem:[%s4169_s0 + $0x50] sm:$0xff]  }
 0x25f   :  { %v841_v39 = vmul.f32 1.442695, %v781_v47  ;;  %v3667_v18 = vpop.eup %2784  ;;  %v843_v20 = vmul.f32 1.442695, %v782_v4  ;;  %v2911_v4 = vld [vmem:[%s4169_s0 + $0x60] sm:$0xff]   ;;  %v2912_v47 = vld [vmem:[%s4169_s0 + $0x78] sm:$0xff]  }
 0x260   :  { %v749_v51 = vpop.xlane.xlu0 %748  ;;  %v752_v25 = vpop.xlane.xlu1 %751  ;;  %v915_v21 = vsel %vm370_vm1, %v3667_v18, 0.0 }
 0x261   :  { %v783_v49 = vsub.f32 %v3485_v33, %v749_v51  ;;  %v3674_v22 = vpop.eup %2786  ;;  %2796 = vpow2.f32 %v841_v39  ;;  %913 = vadd.xlane.f32.xlu1 %v912_v50  ;;  %916 = vadd.xlane.f32.xlu0 %v915_v21  ;;  %v784_v0 = vsub.f32 %v3482_v28, %v752_v25 }
 0x262   :  { %2798 = vpow2.f32 %v843_v20  ;;  %v918_v33 = vsel %vm370_vm1, %v3674_v22, 0.0 }
 0x263   :  { %v3676_v15 = vpop.eup %2788  ;;  %v845_v63 = vmul.f32 1.442695, %v783_v49  ;;  %v847_v32 = vmul.f32 1.442695, %v784_v0 }
 0x264   :  { %v921_v16 = vsel %vm370_vm1, %v3676_v15, 0.0  ;;  %v3683_v60 = vpop.eup %2790 }
 0x265   :  { %919 = vadd.xlane.f32.xlu1 %v918_v33  ;;  %922 = vadd.xlane.f32.xlu0 %v921_v16  ;;  %2800 = vpow2.f32 %v845_v63  ;;  %v924_v37 = vsel %vm370_vm1, %v3683_v60, 0.0 }
 0x266   :  { %2802 = vpow2.f32 %v847_v32  ;;  %v3729_v14 = vpop.trf.xlu0  ;;  %v3731_v39 = vpop.trf.xlu1 }
 0x267   :  { %v3685_v62 = vpop.eup %2792 }
 0x268   :  { %v927_v28 = vsel %vm370_vm1, %v3685_v62, 0.0  ;;  %v3691_v44 = vpop.eup %2794 }
 0x269   :  { %925 = vadd.xlane.f32.xlu1 %v924_v37  ;;  %928 = vadd.xlane.f32.xlu0 %v927_v28  ;;  %v930_v26 = vsel %vm370_vm1, %v3691_v44, 0.0 }
 0x26b   :  { %v3693_v41 = vpop.eup %2796 }
 0x26c   :  { %v933_v56 = vsel %vm370_vm1, %v3693_v41, 0.0  ;;  %v3699_v58 = vpop.eup %2798 }
 0x26d   :  { %931 = vadd.xlane.f32.xlu1 %v930_v26  ;;  %934 = vadd.xlane.f32.xlu0 %v933_v56  ;;  %v936_v38 = vsel %vm370_vm1, %v3699_v58, 0.0 }
 0x26f   :  { %v3703_v42 = vpop.eup %2800 }
 0x270   :  { %v939_v6 = vsel %vm370_vm1, %v3703_v42, 0.0  ;;  %v3707_v27 = vpop.eup %2802 }
 0x271   :  { %937 = vadd.xlane.f32.xlu1 %v936_v38  ;;  %v942_v31 = vsel %vm370_vm1, %v3707_v27, 0.0 }
 0x275   :  { %940 = vadd.xlane.f32.xlu1 %v939_v6 }
 0x279   :  { %943 = vadd.xlane.f32.xlu1 %v942_v31 }
 0x29a   :  { %1460 = vxpose.xlu0.c.b16.start [1/2] (short) (narrow) %v2908_v9, 16 }
 0x29e   :  { %1461 = vxpose.xlu0.c.b16.end [2/2] (short) (narrow) %v2909_v46, 16 }
 0x2a2   :  { %1584 = vxpose.xlu0.c.b16.start [1/2] (short) (narrow) %v2910_v61, 16 }
 0x2a6   :  { %1522 = vxpose.xlu1.c.b16.start [1/2] (short) (narrow) %v2911_v4, 16  ;;  %1585 = vxpose.xlu0.c.b16.end [2/2] (short) (narrow) %v2912_v47, 16 }
 0x2aa   :  { %1523 = vxpose.xlu1.c.b16.end [2/2] (short) (narrow) %v2913_v13, 16 }
 0x2c2   :  { %v851_v20 = vpop.xlane.xlu0 %850 }
 0x2c3   :  { %2804 = vrcp.f32 %v851_v20 }
 0x2c6   :  { %v854_v51 = vpop.xlane.xlu1 %853  ;;  %v857_v25 = vpop.xlane.xlu0 %856 }
 0x2c7   :  { %2806 = vrcp.f32 %v854_v51 }
 0x2c8   :  { %2808 = vrcp.f32 %v857_v25 }
 0x2ca   :  { %v860_v49 = vpop.xlane.xlu1 %859  ;;  %v863_v50 = vpop.xlane.xlu0 %862 }
 0x2cb   :  { %2810 = vrcp.f32 %v860_v49 }
 0x2cc   :  { %2812 = vrcp.f32 %v863_v50 }
 0x2cd   :  { %v2805_v21 = vpop.eup %2804 }
 0x2ce   :  { %v866_v0 = vpop.xlane.xlu1 %865  ;;  %v869_v63 = vpop.xlane.xlu0 %868  ;;  %v977_v33 = vmul.f32 %v2805_v21, %v3553_v3 }
 0x2cf   :  { %2814 = vrcp.f32 %v866_v0 }
 0x2d0   :  { %2816 = vrcp.f32 %v869_v63  ;;  %v1009_v38 = vsel %vm370_vm1, %v977_v33, 0.0 }
 0x2d1   :  { %v2807_v16 = vpop.eup %2806 }
 0x2d2   :  { %v2809_v32 = vpop.eup %2808  ;;  %v872_v37 = vpop.xlane.xlu1 %871  ;;  %v978_v26 = vmul.f32 %v2807_v16, %v3561_v59 }
 0x2d3   :  { %v875_v28 = vpop.xlane.xlu0 %874  ;;  %2818 = vrcp.f32 %v872_v37  ;;  %v979_v56 = vmul.f32 %v2809_v32, %v3559_v29 }
 0x2d4   :  { %2820 = vrcp.f32 %v875_v28  ;;  %v1010_v6 = vsel %vm370_vm1, %v978_v26, 0.0  ;;  %v1131_v31 = vpack.c.bf16 %v978_v26, %v977_v33 }
 0x2d5   :  { %v2811_v9 = vpop.eup %2810  ;;  %v1011_v46 = vadd.f32 %v1010_v6, %v1009_v38  ;;  %v1012_v13 = vsel %vm370_vm1, %v979_v56, 0.0 }
 0x2d6   :  { %v2813_v61 = vpop.eup %2812  ;;  %v878_v4 = vpop.xlane.xlu1 %877  ;;  %2599 = vmatpush3.bf16.msra.mxu1 %v1131_v31  ;;  %v980_v47 = vmul.f32 %v2811_v9, %v3569_v2 }
 0x2d7   :  { %v881_v3 = vpop.xlane.xlu0 %880  ;;  %2822 = vrcp.f32 %v878_v4  ;;  %2600 = vmatprep.subr.bf16.mxu1 %v2938_v24  ;;  %v1013_v29 = vadd.f32 %v1012_v13, %v1011_v46  ;;  %v981_v51 = vmul.f32 %v2813_v61, %v3571_v7 }
 0x2d8   :  { %2824 = vrcp.f32 %v881_v3  ;;  %v1014_v59 = vsel %vm370_vm1, %v980_v47, 0.0  ;;  %v1132_v20 = vpack.c.bf16 %v980_v47, %v979_v56 }
 0x2d9   :  { %v2815_v25 = vpop.eup %2814  ;;  %v3743_v49 = vadd.f32 %v1014_v59, %v1013_v29  ;;  %v1022_v33 = vsel %vm370_vm1, %v981_v51, 0.0 }
 0x2da   :  { %v2817_v50 = vpop.eup %2816  ;;  %v884_v21 = vpop.xlane.xlu1 %883  ;;  %2601 = vmatpush3.bf16.msra.mxu1 %v1132_v20  ;;  %v982_v2 = vmul.f32 %v2815_v25, %v3579_v43 }
 0x2db   :  { %v887_v0 = vpop.xlane.xlu0 %886  ;;  %2826 = vrcp.f32 %v884_v21  ;;  %2606 = vmatprep.subr.bf16.mxu1 %v2938_v24  ;;  %v983_v63 = vmul.f32 %v2817_v50, %v3581_v57 }
 0x2dc   :  { %2828 = vrcp.f32 %v887_v0  ;;  %v1023_v7 = vsel %vm370_vm1, %v982_v2, 0.0  ;;  %v1133_v16 = vpack.c.bf16 %v982_v2, %v981_v51 }
 0x2dd   :  { %v2819_v32 = vpop.eup %2818  ;;  %2603 = vmatmul.mubr.msk.bf16.vlgmr.msra.gmra.mrb[0].mxu1 %vm1165_vm3, %v3539_v17  ;;  %v1024_v37 = vadd.f32 %v1023_v7, %v1022_v33  ;;  %v1025_v38 = vsel %vm370_vm1, %v983_v63, 0.0 }
 0x2de   :  { %v2821_v28 = vpop.eup %2820  ;;  %v890_v26 = vpop.xlane.xlu1 %889  ;;  %2607 = vmatpush3.bf16.msra.mxu1 %v1133_v16  ;;  %v984_v56 = vmul.f32 %v2819_v32, %v3589_v5  ;;  %2610 = vmatprep.mubr.msk.bf16.mxu1 %vm2939_vm2, %v2938_v24 }
 0x2df   :  { %v893_v43 = vpop.xlane.xlu0 %892  ;;  %2830 = vrcp.f32 %v890_v26  ;;  %2608 = vmatprep.subr.bf16.mxu1 %v2938_v24  ;;  %v1026_v57 = vadd.f32 %v1025_v38, %v1024_v37  ;;  %v985_v17 = vmul.f32 %v2821_v28, %v3591_v36 }
 0x2e0   :  { %2832 = vrcp.f32 %v893_v43  ;;  %v1134_v6 = vpack.c.bf16 %v984_v56, %v983_v63  ;;  %v1027_v31 = vsel %vm370_vm1, %v984_v56, 0.0 }
 0x2e1   :  { %v2823_v9 = vpop.eup %2822  ;;  %v3759_v46 = vadd.f32 %v1027_v31, %v1026_v57  ;;  %v1035_v13 = vsel %vm370_vm1, %v985_v17, 0.0 }
 0x2e2   :  { %v2825_v61 = vpop.eup %2824  ;;  %v896_v5 = vpop.xlane.xlu1 %895  ;;  %2609 = vmatpush3.bf16.msra.mxu1 %v1134_v6  ;;  %v986_v3 = vmul.f32 %v2823_v9, %v3599_v53 }
 0x2e3   :  { %v899_v4 = vpop.xlane.xlu0 %898  ;;  %2834 = vrcp.f32 %v896_v5  ;;  %2614 = vmatprep.subr.bf16.mxu1 %v2938_v24  ;;  %v987_v47 = vmul.f32 %v2825_v61, %v3601_v54 }
 0x2e4   :  { %2836 = vrcp.f32 %v899_v4  ;;  %v1036_v36 = vsel %vm370_vm1, %v986_v3, 0.0  ;;  %v1135_v29 = vpack.c.bf16 %v986_v3, %v985_v17 }
 0x2e5   :  { %v2827_v59 = vpop.eup %2826  ;;  %2611 = vmatmul.mubr.msk.bf16.vlgmr.msra.gmra.mrb[4].mxu1 %vm1165_vm3, %v3541_v19  ;;  %v1037_v20 = vadd.f32 %v1036_v36, %v1035_v13  ;;  %v1038_v54 = vsel %vm370_vm1, %v987_v47, 0.0 }
 0x2e6   :  { %v2829_v51 = vpop.eup %2828  ;;  %v902_v25 = vpop.xlane.xlu1 %901  ;;  %2615 = vmatpush3.bf16.msra.mxu1 %v1135_v29  ;;  %v988_v50 = vmul.f32 %v2827_v59, %v3609_v12  ;;  %2618 = vmatprep.mubr.msk.bf16.mxu1 %vm2939_vm2, %v2938_v24 }
 0x2e7   :  { %v905_v53 = vpop.xlane.xlu0 %904  ;;  %2838 = vrcp.f32 %v902_v25  ;;  %2616 = vmatprep.subr.bf16.mxu1 %v2938_v24  ;;  %v989_v0 = vmul.f32 %v2829_v51, %v3611_v40  ;;  %v1039_v19 = vadd.f32 %v1038_v54, %v1037_v20 }
 0x2e8   :  { %2840 = vrcp.f32 %v905_v53  ;;  %v1136_v21 = vpack.c.bf16 %v988_v50, %v987_v47  ;;  %v1040_v63 = vsel %vm370_vm1, %v988_v50, 0.0 }
 0x2e9   :  { %v2831_v2 = vpop.eup %2830  ;;  %v3776_v32 = vadd.f32 %v1040_v63, %v1039_v19  ;;  %v1048_v40 = vsel %vm370_vm1, %v989_v0, 0.0 }
 0x2ea   :  { %v2833_v33 = vpop.eup %2832  ;;  %v908_v7 = vpop.xlane.xlu1 %907  ;;  %2617 = vmatpush3.bf16.msra.mxu1 %v1136_v21  ;;  %v990_v16 = vmul.f32 %v2831_v2, %v3619_v10 }
 0x2eb   :  { %v911_v12 = vpop.xlane.xlu0 %910  ;;  %2842 = vrcp.f32 %v908_v7  ;;  %2622 = vmatprep.subr.bf16.mxu1 %v2938_v24  ;;  %v991_v37 = vmul.f32 %v2833_v33, %v3621_v52 }
 0x2ec   :  { %2844 = vrcp.f32 %v911_v12  ;;  %v1049_v28 = vsel %vm370_vm1, %v990_v16, 0.0  ;;  %v1137_v26 = vpack.c.bf16 %v990_v16, %v989_v0 }
 0x2ed   :  { %v2835_v43 = vpop.eup %2834  ;;  %2619 = vmatmul.mubr.msk.bf16.vlgmr.msra.gmra.mrb[8].mxu1 %vm1165_vm3, %v3543_v48  ;;  %v1050_v56 = vadd.f32 %v1049_v28, %v1048_v40  ;;  %v1051_v17 = vsel %vm370_vm1, %v991_v37, 0.0 }
 0x2ee   :  { %v2837_v38 = vpop.eup %2836  ;;  %v914_v10 = vpop.xlane.xlu1 %913  ;;  %2623 = vmatpush3.bf16.msra.mxu1 %v1137_v26  ;;  %v992_v6 = vmul.f32 %v2835_v43, %v3629_v55  ;;  %2626 = vmatprep.mubr.msk.bf16.mxu1 %vm2939_vm2, %v2938_v24 }
 0x2ef   :  { %v917_v57 = vpop.xlane.xlu0 %916  ;;  %2846 = vrcp.f32 %v914_v10  ;;  %2624 = vmatprep.subr.bf16.mxu1 %v2938_v24  ;;  %v1052_v52 = vadd.f32 %v1051_v17, %v1050_v56  ;;  %v993_v48 = vmul.f32 %v2837_v38, %v3631_v23 }
 0x2f0   :  { %2848 = vrcp.f32 %v917_v57  ;;  %v1138_v31 = vpack.c.bf16 %v992_v6, %v991_v37  ;;  %v1053_v61 = vsel %vm370_vm1, %v992_v6, 0.0 }
 0x2f1   :  { %v2839_v9 = vpop.eup %2838  ;;  %v3792_v47 = vadd.f32 %v1053_v61, %v1052_v52  ;;  %v1061_v36 = vsel %vm370_vm1, %v993_v48, 0.0 }
 0x2f2   :  { %v2841_v5 = vpop.eup %2840  ;;  %v920_v4 = vpop.xlane.xlu1 %919  ;;  %2625 = vmatpush3.bf16.msra.mxu1 %v1138_v31  ;;  %v994_v3 = vmul.f32 %v2839_v9, %v3639_v35 }
 0x2f3   :  { %v923_v55 = vpop.xlane.xlu0 %922  ;;  %2850 = vrcp.f32 %v920_v4  ;;  %2630 = vmatprep.subr.bf16.mxu1 %v2938_v24  ;;  %v995_v13 = vmul.f32 %v2841_v5, %v3643_v1 }
 0x2f4   :  { %2852 = vrcp.f32 %v923_v55  ;;  %v1062_v23 = vsel %vm370_vm1, %v994_v3, 0.0  ;;  %v1139_v29 = vpack.c.bf16 %v994_v3, %v993_v48 }
 0x2f5   :  { %v2843_v59 = vpop.eup %2842  ;;  %2627 = vmatmul.mubr.msk.bf16.vlgmr.msra.gmra.mrb[12].mxu1 %vm1165_vm3, %v3729_v14  ;;  %v1063_v20 = vadd.f32 %v1062_v23, %v1061_v36  ;;  %v1064_v50 = vsel %vm370_vm1, %v995_v13, 0.0 }
 0x2f6   :  { %v2845_v51 = vpop.eup %2844  ;;  %v926_v35 = vpop.xlane.xlu1 %925  ;;  %2631 = vmatpush3.bf16.msra.mxu1 %v1139_v29  ;;  %v996_v53 = vmul.f32 %v2843_v59, %v3651_v11  ;;  %2634 = vmatprep.mubr.msk.bf16.mxu1 %vm2939_vm2, %v2938_v24 }
 0x2f7   :  { %v929_v25 = vpop.xlane.xlu0 %928  ;;  %2854 = vrcp.f32 %v926_v35  ;;  %2632 = vmatprep.subr.bf16.mxu1 %v2938_v24  ;;  %v1065_v1 = vadd.f32 %v1064_v50, %v1063_v20  ;;  %v997_v14 = vmul.f32 %v2845_v51, %v3653_v45 }
 0x2f8   :  { %2856 = vrcp.f32 %v929_v25  ;;  %v1140_v54 = vpack.c.bf16 %v996_v53, %v995_v13  ;;  %v1066_v21 = vsel %vm370_vm1, %v996_v53, 0.0 }
 0x2f9   :  { %v2847_v0 = vpop.eup %2846  ;;  %v3807_v19 = vadd.f32 %v1066_v21, %v1065_v1  ;;  %v1074_v12 = vsel %vm370_vm1, %v997_v14, 0.0 }
 0x2fa   :  { %v2849_v2 = vpop.eup %2848  ;;  %v932_v11 = vpop.xlane.xlu1 %931  ;;  %2633 = vmatpush3.bf16.msra.mxu1 %v1140_v54  ;;  %v998_v33 = vmul.f32 %v2847_v0, %v3661_v8 }
 0x2fb   :  { %v935_v63 = vpop.xlane.xlu0 %934  ;;  %2858 = vrcp.f32 %v932_v11  ;;  %2638 = vmatprep.subr.bf16.mxu1 %v2938_v24  ;;  %v999_v7 = vmul.f32 %v2849_v2, %v3667_v18 }
 0x2fc   :  { %2860 = vrcp.f32 %v935_v63  ;;  %v1075_v45 = vsel %vm370_vm1, %v998_v33, 0.0  ;;  %v1141_v16 = vpack.c.bf16 %v998_v33, %v997_v14 }
 0x2fd   :  { %v2851_v37 = vpop.eup %2850  ;;  %2635 = vmatmul.mubr.msk.bf16.vlgmr.msra.gmra.mrb[16].mxu1 %vm1165_vm3, %v3731_v39  ;;  %v1076_v40 = vadd.f32 %v1075_v45, %v1074_v12  ;;  %v1077_v43 = vsel %vm370_vm1, %v999_v7, 0.0 }
 0x2fe   :  { %v2853_v28 = vpop.eup %2852  ;;  %v938_v26 = vpop.xlane.xlu1 %937  ;;  %2639 = vmatpush3.bf16.msra.mxu1 %v1141_v16  ;;  %v1000_v8 = vmul.f32 %v2851_v37, %v3674_v22  ;;  %2642 = vmatprep.mubr.msk.bf16.mxu1 %vm2939_vm2, %v2938_v24  ;;  %v1042_v16 = vrot.slane %v3776_v32, 4 }
 0x2ff   :  { %2862 = vrcp.f32 %v938_v26  ;;  %2640 = vmatprep.subr.bf16.mxu1 %v2938_v24  ;;  %v1078_v18 = vadd.f32 %v1077_v43, %v1076_v40  ;;  %v1001_v38 = vmul.f32 %v2853_v28, %v3676_v15 }
 0x300   :  { %v1142_v56 = vpack.c.bf16 %v1000_v8, %v999_v7  ;;  %v1079_v39 = vsel %vm370_vm1, %v1000_v8, 0.0  ;;  %v1468_v22 = vpop.trf.xlu0  ;;  %v1043_v28 = vadd.f32 %v1042_v16, %v3776_v32  ;;  %v3867_v8 = vld [vmem:[%s4171_s2] sm:$0xff] }
 0x301   :  { %v2855_v10 = vpop.eup %2854  ;;  %v3823_v57 = vadd.f32 %v1079_v39, %v1078_v18  ;;  %v1087_v48 = vsel %vm370_vm1, %v1001_v38, 0.0 }
 0x302   :  { %v2857_v6 = vpop.eup %2856  ;;  %v941_v17 = vpop.xlane.xlu1 %940  ;;  %2641 = vmatpush3.bf16.msra.mxu1 %v1142_v56  ;;  %v1002_v52 = vmul.f32 %v2855_v10, %v3683_v60  ;;  %v1044_v43 = vrot.slane %v1043_v28, 2  ;;  %v1055_v56 = vrot.slane %v3792_v47, 4 }
 0x303   :  { %2864 = vrcp.f32 %v941_v17  ;;  %2646 = vmatprep.subr.bf16.mxu1 %v2938_v24  ;;  %v1003_v31 = vmul.f32 %v2857_v6, %v3685_v62 }
 0x304   :  { %v1088_v15 = vsel %vm370_vm1, %v1002_v52, 0.0  ;;  %v1143_v9 = vpack.c.bf16 %v1002_v52, %v1001_v38 }
 0x305   :  { %v2859_v61 = vpop.eup %2858  ;;  %2643 = vmatmul.mubr.msk.bf16.vlgmr.msra.gmra.mrb[20].mxu1 %vm1165_vm3, %v1468_v22  ;;  %v1089_v5 = vadd.f32 %v1088_v15, %v1087_v48  ;;  %v1090_v60 = vsel %vm370_vm1, %v1003_v31, 0.0  ;;  %v1045_v22 = vadd.f32 %v1044_v43, %v1043_v28  ;;  %v1056_v15 = vadd.f32 %v1055_v56, %v3792_v47 }
 0x306   :  { %v2861_v4 = vpop.eup %2860  ;;  %v944_v55 = vpop.xlane.xlu1 %943  ;;  %2647 = vmatpush3.bf16.msra.mxu1 %v1143_v9  ;;  %v1004_v3 = vmul.f32 %v2859_v61, %v3691_v44  ;;  %2650 = vmatprep.mubr.msk.bf16.mxu1 %vm2939_vm2, %v2938_v24 }
 0x307   :  { %2866 = vrcp.f32 %v944_v55  ;;  %2648 = vmatprep.subr.bf16.mxu1 %v2938_v24  ;;  %v1005_v13 = vmul.f32 %v2861_v4, %v3693_v41  ;;  %v1091_v36 = vadd.f32 %v1090_v60, %v1089_v5  ;;  %v1046_v5 = vrot.slane %v1045_v22, 1 }
 0x308   :  { %v1144_v62 = vpack.c.bf16 %v1004_v3, %v1003_v31  ;;  %v1092_v23 = vsel %vm370_vm1, %v1004_v3, 0.0  ;;  %v1592_v11 = vpop.trf.xlu0  ;;  %v1057_v3 = vrot.slane %v1056_v15, 2  ;;  %v1068_v60 = vrot.slane %v3807_v19, 4 }
 0x309   :  { %v2863_v29 = vpop.eup %2862  ;;  %v3839_v20 = vadd.f32 %v1092_v23, %v1091_v36  ;;  %v1100_v51 = vsel %vm370_vm1, %v1005_v13, 0.0 }
 0x30a   :  { %2649 = vmatpush3.bf16.msra.mxu1 %v1144_v62  ;;  %v1006_v59 = vmul.f32 %v2863_v29, %v3699_v58 }
 0x30b   :  { %2654 = vmatprep.subr.bf16.mxu1 %v2938_v24 }
 0x30c   :  { %v1530_v44 = vpop.trf.xlu1  ;;  %v1101_v35 = vsel %vm370_vm1, %v1006_v59, 0.0  ;;  %v1145_v25 = vpack.c.bf16 %v1006_v59, %v1005_v13 }
 0x30d   :  { %v2865_v53 = vpop.eup %2864  ;;  %2651 = vmatmul.mubr.msk.bf16.vlgmr.msra.gmra.mrb[24].mxu1 %vm1165_vm3, %v1530_v44  ;;  %v1102_v41 = vadd.f32 %v1101_v35, %v1100_v51  ;;  %v1047_v44 = vadd.f32 %v1046_v5, %v1045_v22 }
 0x30e   :  { %2655 = vmatpush3.bf16.msra.mxu1 %v1145_v25  ;;  %v1007_v50 = vmul.f32 %v2865_v53, %v3703_v42  ;;  %2658 = vmatprep.mubr.msk.bf16.mxu1 %vm2939_vm2, %v2938_v24  ;;  %v1016_v42 = vrot.slane %v3743_v49, 4  ;;  %v1058_v53 = vadd.f32 %v1057_v3, %v1056_v15 }
 0x30f   :  { %2656 = vmatprep.subr.bf16.mxu1 %v2938_v24 }
 0x310   :  { %v1103_v58 = vsel %vm370_vm1, %v1007_v50, 0.0  ;;  %v1017_v63 = vadd.f32 %v1016_v42, %v3743_v49  ;;  %v3872_v49 = vld [vmem:[%s4171_s2 + $0x8] sm:$0xff]  ;;  %s2951_s2 = smov 24  }
 0x311   :  { %v2867_v1 = vpop.eup %2866  ;;  %v1104_v54 = vadd.f32 %v1103_v58, %v1102_v41  ;;  %v1069_v41 = vadd.f32 %v1068_v60, %v3807_v19 }
 0x312   :  { %v1008_v14 = vmul.f32 %v2867_v1, %v3707_v27  ;;  %v1029_v27 = vrot.slane %v3759_v46, 4  ;;  %v1018_v33 = vrot.slane %v1017_v63, 2  ;;  %v1081_v1 = vrot.slane %v3823_v57, 4 }
 0x313   :  { %v1070_v42 = vrot.slane %v1069_v41, 2 }
 0x314   :  { %v1146_v21 = vpack.c.bf16 %v1008_v14, %v1007_v50  ;;  %v1105_v0 = vsel %vm370_vm1, %v1008_v14, 0.0  ;;  %v1030_v7 = vadd.f32 %v1029_v27, %v3759_v46  ;;  %v1019_v12 = vadd.f32 %v1018_v33, %v1017_v63 }
 0x315   :  { %v3852_v2 = vadd.f32 %v1105_v0, %v1104_v54  ;;  %v1119_v14 = vmul.f32 %v3867_v8, %v1047_v44 }
 0x316   :  { %2657 = vmatpush3.bf16.msra.mxu1 %v1146_v21  ;;  %v1031_v45 = vrot.slane %v1030_v7, 2  ;;  %v1020_v37 = vrot.slane %v1019_v12, 1 }
 0x317   :  { %2682 = vmatprep.subr.bf16.mxu1 %v2938_v24 }
 0x318   :  { %v1032_v40 = vadd.f32 %v1031_v45, %v1030_v7  ;;  %v1021_v26 = vadd.f32 %v1020_v37, %v1019_v12  ;;  %v1120_v12 = vmul.f32 %v3872_v49, %v1047_v44  ;;  %v1082_v45 = vadd.f32 %v1081_v1, %v3823_v57 }
 0x319   :  { %2659 = vmatmul.mubr.msk.bf16.vlgmr.msra.gmra.mrb[28].mxu1 %vm1165_vm3, %v1592_v11  ;;  %v1059_v11 = vrot.slane %v1058_v53, 1  ;;  %v1094_v57 = vrot.slane %v3839_v20, 4 }
 0x31a   :  { %2686 = vmatprep.mubr.msk.bf16.mxu1 %vm2939_vm2, %v2938_v24  ;;  %v1033_v46 = vrot.slane %v1032_v40, 1  ;;  %v1115_v18 = vmul.f32 %v3867_v8, %v1021_v26  ;;  %v1116_v10 = vmul.f32 %v3872_v49, %v1021_v26 }
 0x31b   :  { %v1060_v43 = vadd.f32 %v1059_v11, %v1058_v53 }
 0x31c   :  { %v1034_v17 = vadd.f32 %v1033_v46, %v1032_v40 }
 0x31d   :  { %v1122_v3 = vmul.f32 %v3872_v49, %v1060_v43 }
 0x31e   :  { %v1117_v61 = vmul.f32 %v3867_v8, %v1034_v17  ;;  %v1118_v47 = vmul.f32 %v3872_v49, %v1034_v17 }
 0x3b0   :  { %v1203_v38 = vpop.f32.mrb[0].mxu1 }
 0x3b1   :  { %v3876_v39 = vsub.f32 %v1203_v38, %v1115_v18  ;;  %v2604_v32 = vpop.f32.mrb[1].mxu1  ;;  %v1071_v18 = vadd.f32 %v1070_v42, %v1069_v41 }
 0x3b2   :  { %v1206_v6 = vpop.f32.mrb[2].mxu1 }
 0x3b3   :  { %v1660_v52 = vmul.f32 %v3876_v39, %v3876_v39  ;;  %v3881_v31 = vsub.f32 %v1206_v6, %v1116_v10  ;;  %v2605_v48 = vpop.f32.mrb[3].mxu1  ;;  %v1083_v10 = vrot.slane %v1082_v45, 2  ;;  %v1072_v15 = vrot.slane %v1071_v18, 1 }
 0x3b4   :  { %v1121_v48 = vmul.f32 %v3867_v8, %v1060_v43 }
 0x3b5   :  { %v1661_v9 = vmul.f32 %v3881_v31, %v3881_v31  ;;  %v1676_v4 = vsel %vm370_vm1, %v1660_v52, 0.0  ;;  %v1084_v60 = vadd.f32 %v1083_v10, %v1082_v45 }
 0x3b7   :  { %v1677_v55 = vsel %vm370_vm1, %v1661_v9, 0.0 }
 0x3b8   :  { %v1678_v62 = vadd.f32 %v1677_v55, %v1676_v4  ;;  %v1265_v13 = vpop.f32.mrb[4].mxu1 }
 0x3b9   :  { %v3890_v36 = vsub.f32 %v1265_v13, %v1117_v61  ;;  %v2612_v23 = vpop.f32.mrb[5].mxu1 }
 0x3ba   :  { %v1679_v29 = vrot.slane %v1678_v62, 4  ;;  %v1268_v59 = vpop.f32.mrb[6].mxu1 }
 0x3bb   :  { %v1662_v51 = vmul.f32 %v3890_v36, %v3890_v36  ;;  %v3895_v35 = vsub.f32 %v1268_v59, %v1118_v47  ;;  %v2613_v25 = vpop.f32.mrb[7].mxu1  ;;  %v1095_v47 = vadd.f32 %v1094_v57, %v3839_v20 }
 0x3bc   :  { %v1680_v50 = vadd.f32 %v1679_v29, %v1678_v62 }
 0x3bd   :  { %v1663_v58 = vmul.f32 %v3895_v35, %v3895_v35  ;;  %v1685_v21 = vsel %vm370_vm1, %v1662_v51, 0.0  ;;  %v1073_v51 = vadd.f32 %v1072_v15, %v1071_v18 }
 0x3be   :  { %v1681_v54 = vrot.slane %v1680_v50, 2 }
 0x3bf   :  { %v1686_v0 = vsel %vm370_vm1, %v1663_v58, 0.0 }
 0x3c0   :  { %v1682_v63 = vadd.f32 %v1681_v54, %v1680_v50  ;;  %v1687_v27 = vadd.f32 %v1686_v0, %v1685_v21  ;;  %v1327_v33 = vpop.f32.mrb[8].mxu1  ;;  %v1085_v50 = vrot.slane %v1084_v60, 1  ;;  %v1096_v54 = vrot.slane %v1095_v47, 2 }
 0x3c1   :  { %v3904_v7 = vsub.f32 %v1327_v33, %v1119_v14  ;;  %v2620_v19 = vpop.f32.mrb[9].mxu1  ;;  %v1123_v21 = vmul.f32 %v3867_v8, %v1073_v51  ;;  %v1124_v33 = vmul.f32 %v3872_v49, %v1073_v51 }
 0x3c2   :  { %v1683_v16 = vrot.slane %v1682_v63, 1  ;;  %v1688_v37 = vrot.slane %v1687_v27, 4  ;;  %v1330_v40 = vpop.f32.mrb[10].mxu1  ;;  %v1086_v19 = vadd.f32 %v1085_v50, %v1084_v60 }
 0x3c3   :  { %v1664_v28 = vmul.f32 %v3904_v7, %v3904_v7  ;;  %v3910_v26 = vsub.f32 %v1330_v40, %v1120_v12  ;;  %v2621_v46 = vpop.f32.mrb[11].mxu1  ;;  %v1097_v40 = vadd.f32 %v1096_v54, %v1095_v47 }
 0x3c4   :  { %v1684_v56 = vadd.f32 %v1683_v16, %v1682_v63  ;;  %v1689_v38 = vadd.f32 %v1688_v37, %v1687_v27  ;;  %v1125_v57 = vmul.f32 %v3867_v8, %v1086_v19 }
 0x3c5   :  { %v1665_v32 = vmul.f32 %v3910_v26, %v3910_v26  ;;  %v1694_v22 = vsel %vm370_vm1, %v1664_v28, 0.0  ;;  %v1107_v28 = vrot.slane %v3852_v2, 4 }
 0x3c6   :  { %v1748_v6 = vmax.f32 %v1684_v56, 1e-24  ;;  %v1690_v17 = vrot.slane %v1689_v38, 2 }
 0x3c7   :  { %v1695_v52 = vsel %vm370_vm1, %v1665_v32, 0.0  ;;  %v1108_v15 = vadd.f32 %v1107_v28, %v3852_v2 }
 0x3c8   :  { %2868 = vrsqrt.f32 %v1748_v6  ;;  %v1691_v9 = vadd.f32 %v1690_v17, %v1689_v38  ;;  %v1696_v61 = vadd.f32 %v1695_v52, %v1694_v22  ;;  %v1389_v5 = vpop.f32.mrb[12].mxu1 }
 0x3c9   :  { %v3918_v4 = vsub.f32 %v1389_v5, %v1121_v48  ;;  %v2628_v55 = vpop.f32.mrb[13].mxu1  ;;  %v1098_v48 = vrot.slane %v1097_v40, 1 }
 0x3ca   :  { %v1692_v62 = vrot.slane %v1691_v9, 1  ;;  %v1697_v13 = vrot.slane %v1696_v61, 4  ;;  %v1392_v23 = vpop.f32.mrb[14].mxu1 }
 0x3cb   :  { %v1666_v29 = vmul.f32 %v3918_v4, %v3918_v4  ;;  %v3924_v59 = vsub.f32 %v1392_v23, %v1122_v3  ;;  %v2629_v44 = vpop.f32.mrb[15].mxu1  ;;  %v1126_v23 = vmul.f32 %v3872_v49, %v1086_v19  ;;  %v1099_v51 = vadd.f32 %v1098_v48, %v1097_v40 }
 0x3cc   :  { %v1693_v25 = vadd.f32 %v1692_v62, %v1691_v9  ;;  %v1698_v53 = vadd.f32 %v1697_v13, %v1696_v61 }
 0x3cd   :  { %v1667_v41 = vmul.f32 %v3924_v59, %v3924_v59  ;;  %v1703_v14 = vsel %vm370_vm1, %v1666_v29, 0.0  ;;  %v1127_v19 = vmul.f32 %v3867_v8, %v1099_v51  ;;  %v1128_v28 = vmul.f32 %v3872_v49, %v1099_v51 }
 0x3ce   :  { %v1749_v58 = vmax.f32 %v1693_v25, 1e-24  ;;  %v1699_v1 = vrot.slane %v1698_v53, 2  ;;  %v1109_v25 = vrot.slane %v1108_v15, 2 }
 0x3cf   :  { %v1704_v20 = vsel %vm370_vm1, %v1667_v41, 0.0 }
 0x3d0   :  { %2870 = vrsqrt.f32 %v1749_v58  ;;  %v1700_v0 = vadd.f32 %v1699_v1, %v1698_v53  ;;  %v1705_v11 = vadd.f32 %v1704_v20, %v1703_v14  ;;  %v1451_v42 = vpop.f32.mrb[16].mxu1 }
 0x3d1   :  { %v3931_v63 = vsub.f32 %v1451_v42, %v1123_v21  ;;  %v2636_v27 = vpop.f32.mrb[17].mxu1  ;;  %v1110_v42 = vadd.f32 %v1109_v25, %v1108_v15 }
 0x3d2   :  { %v2869_v12 = vpop.eup %2868  ;;  %v1701_v45 = vrot.slane %v1700_v0, 1  ;;  %v1706_v16 = vrot.slane %v1705_v11, 4  ;;  %v1454_v37 = vpop.f32.mrb[18].mxu1 }
 0x3d3   :  { %v3936_v46 = vmul.f32 %v2869_v12, %v3881_v31  ;;  %v1668_v43 = vmul.f32 %v3931_v63, %v3931_v63  ;;  %v3940_v18 = vsub.f32 %v1454_v37, %v1124_v33  ;;  %v2637_v56 = vpop.f32.mrb[19].mxu1  ;;  %v3943_v38 = vmul.f32 %v2869_v12, %v3876_v39 }
 0x3d4   :  { %v1702_v32 = vadd.f32 %v1701_v45, %v1700_v0  ;;  %v1707_v10 = vadd.f32 %v1706_v16, %v1705_v11 }
 0x3d5   :  { %v1669_v6 = vmul.f32 %v3940_v18, %v3940_v18  ;;  %v1781_v17 = vmul.f32 %v3936_v46, %v3936_v46  ;;  %v1780_v31 = vmul.f32 %v3943_v38, %v3943_v38  ;;  %v1712_v39 = vsel %vm370_vm1, %v1668_v43, 0.0 }
 0x3d6   :  { %v1750_v22 = vmax.f32 %v1702_v32, 1e-24  ;;  %v1708_v52 = vrot.slane %v1707_v10, 2 }
 0x3d7   :  { %v1713_v9 = vsel %vm370_vm1, %v1669_v6, 0.0  ;;  %v1799_v61 = vsel %vm370_vm1, %v1781_v17, 0.0  ;;  %v1796_v5 = vsel %vm370_vm1, %v1780_v31, 0.0  ;;  %v1111_v17 = vrot.slane %v1110_v42, 1 }
 0x3d8   :  { %2872 = vrsqrt.f32 %v1750_v22  ;;  %v1709_v55 = vadd.f32 %v1708_v52, %v1707_v10  ;;  %v1714_v3 = vadd.f32 %v1713_v9, %v1712_v39  ;;  %1800 = vadd.xlane.f32.xlu0 %v1799_v61  ;;  %1797 = vadd.xlane.f32.xlu1 %v1796_v5  ;;  %v1513_v60 = vpop.f32.mrb[20].mxu1 }
 0x3d9   :  { %v3957_v62 = vsub.f32 %v1513_v60, %v1125_v57  ;;  %v2644_v13 = vpop.f32.mrb[21].mxu1 }
 0x3da   :  { %v2871_v2 = vpop.eup %2870  ;;  %v1710_v47 = vrot.slane %v1709_v55, 1  ;;  %v1715_v29 = vrot.slane %v1714_v3, 4  ;;  %v1516_v44 = vpop.f32.mrb[22].mxu1 }
 0x3db   :  { %v3961_v53 = vmul.f32 %v2871_v2, %v3895_v35  ;;  %v1670_v41 = vmul.f32 %v3957_v62, %v3957_v62  ;;  %v3965_v50 = vsub.f32 %v1516_v44, %v1126_v23  ;;  %v2645_v58 = vpop.f32.mrb[23].mxu1  ;;  %v3968_v1 = vmul.f32 %v2871_v2, %v3890_v36 }
 0x3dc   :  { %v1711_v54 = vadd.f32 %v1710_v47, %v1709_v55  ;;  %v1716_v14 = vadd.f32 %v1715_v29, %v1714_v3  ;;  %v1112_v3 = vadd.f32 %v1111_v17, %v1110_v42 }
 0x3dd   :  { %v1671_v20 = vmul.f32 %v3965_v50, %v3965_v50  ;;  %v1782_v21 = vmul.f32 %v3968_v1, %v3968_v1  ;;  %v1783_v11 = vmul.f32 %v3961_v53, %v3961_v53  ;;  %v1721_v27 = vsel %vm370_vm1, %v1670_v41, 0.0 }
 0x3de   :  { %v1751_v0 = vmax.f32 %v1711_v54, 1e-24  ;;  %v1717_v35 = vrot.slane %v1716_v14, 2  ;;  %v1129_v41 = vmul.f32 %v3867_v8, %v1112_v3 }
 0x3df   :  { %v1722_v33 = vsel %vm370_vm1, %v1671_v20, 0.0  ;;  %v1802_v36 = vsel %vm370_vm1, %v1782_v21, 0.0  ;;  %v1805_v6 = vsel %vm370_vm1, %v1783_v11, 0.0 }
 0x3e0   :  { %2874 = vrsqrt.f32 %v1751_v0  ;;  %v1718_v12 = vadd.f32 %v1717_v35, %v1716_v14  ;;  %v1723_v45 = vadd.f32 %v1722_v33, %v1721_v27  ;;  %1803 = vadd.xlane.f32.xlu1 %v1802_v36  ;;  %v1575_v16 = vpop.f32.mrb[24].mxu1  ;;  %v1130_v35 = vmul.f32 %v3872_v49, %v1112_v3 }
 0x3e1   :  { %v3980_v37 = vsub.f32 %v1575_v16, %v1127_v19  ;;  %v2652_v40 = vpop.f32.mrb[25].mxu1 }
 0x3e2   :  { %v2873_v43 = vpop.eup %2872  ;;  %v1719_v56 = vrot.slane %v1718_v12, 1  ;;  %v1724_v32 = vrot.slane %v1723_v45, 4  ;;  %v1578_v10 = vpop.f32.mrb[26].mxu1 }
 0x3e3   :  { %v3985_v31 = vmul.f32 %v2873_v43, %v3910_v26  ;;  %v1672_v57 = vmul.f32 %v3980_v37, %v3980_v37  ;;  %v3989_v22 = vsub.f32 %v1578_v10, %v1128_v28  ;;  %v2653_v52 = vpop.f32.mrb[27].mxu1  ;;  %v3992_v48 = vmul.f32 %v2873_v43, %v3904_v7 }
 0x3e4   :  { %v1720_v15 = vadd.f32 %v1719_v56, %v1718_v12  ;;  %v1725_v39 = vadd.f32 %v1724_v32, %v1723_v45  ;;  %1806 = vadd.xlane.f32.xlu1 %v1805_v6 }
 0x3e5   :  { %v1673_v9 = vmul.f32 %v3989_v22, %v3989_v22  ;;  %v1785_v61 = vmul.f32 %v3985_v31, %v3985_v31  ;;  %v1784_v26 = vmul.f32 %v3992_v48, %v3992_v48  ;;  %v1730_v60 = vsel %vm370_vm1, %v1672_v57, 0.0 }
 0x3e6   :  { %v1752_v5 = vmax.f32 %v1720_v15, 1e-24  ;;  %v1726_v55 = vrot.slane %v1725_v39, 2 }
 0x3e7   :  { %v1731_v7 = vsel %vm370_vm1, %v1673_v9, 0.0  ;;  %v1811_v13 = vsel %vm370_vm1, %v1785_v61, 0.0  ;;  %v1808_v23 = vsel %vm370_vm1, %v1784_v26, 0.0 }
 0x3e8   :  { %2876 = vrsqrt.f32 %v1752_v5  ;;  %v1727_v2 = vadd.f32 %v1726_v55, %v1725_v39  ;;  %v1732_v47 = vadd.f32 %v1731_v7, %v1730_v60  ;;  %1812 = vadd.xlane.f32.xlu1 %v1811_v13  ;;  %1809 = vadd.xlane.f32.xlu0 %v1808_v23 }
 0x3ea   :  { %v2875_v29 = vpop.eup %2874  ;;  %v1728_v44 = vrot.slane %v1727_v2, 1  ;;  %v1733_v51 = vrot.slane %v1732_v47, 4 }
 0x3eb   :  { %v4005_v25 = vmul.f32 %v2875_v29, %v3924_v59  ;;  %v4009_v58 = vmul.f32 %v2875_v29, %v3918_v4 }
 0x3ec   :  { %v1729_v54 = vadd.f32 %v1728_v44, %v1727_v2  ;;  %v1734_v14 = vadd.f32 %v1733_v51, %v1732_v47  ;;  %v1637_v20 = vpop.f32.mrb[28].mxu1 }
 0x3ed   :  { %v1658_v21 = vsub.f32 %v1637_v20, %v1129_v41  ;;  %v2660_v0 = vpop.f32.mrb[29].mxu1  ;;  %v1787_v11 = vmul.f32 %v4005_v25, %v4005_v25  ;;  %v1786_v42 = vmul.f32 %v4009_v58, %v4009_v58 }
 0x3ee   :  { %v1753_v59 = vmax.f32 %v1729_v54, 1e-24  ;;  %v1735_v27 = vrot.slane %v1734_v14, 2  ;;  %v1640_v33 = vpop.f32.mrb[30].mxu1 }
 0x3ef   :  { %v1674_v8 = vmul.f32 %v1658_v21, %v1658_v21  ;;  %v1659_v36 = vsub.f32 %v1640_v33, %v1130_v35  ;;  %v2661_v4 = vpop.f32.mrb[31].mxu1  ;;  %v1817_v19 = vsel %vm370_vm1, %v1787_v11, 0.0  ;;  %v1814_v12 = vsel %vm370_vm1, %v1786_v42, 0.0  ;;  %v2728_v42 = vld [vmem:[%s4174_s5] sm:$0xff]  }
 0x3f0   :  { %2878 = vrsqrt.f32 %v1753_v59  ;;  %v1736_v45 = vadd.f32 %v1735_v27, %v1734_v14  ;;  %1818 = vadd.xlane.f32.xlu1 %v1817_v19  ;;  %1815 = vadd.xlane.f32.xlu0 %v1814_v12  ;;  %v2730_v27 = vld [vmem:[%s4174_s5 + $0x10] sm:$0xff]  }
 0x3f1   :  { %v1675_v49 = vmul.f32 %v1659_v36, %v1659_v36  ;;  %v1739_v43 = vsel %vm370_vm1, %v1674_v8, 0.0  ;;  %2663 = vmatpush3.bf16.msra.mxu0 %v2728_v42  ;;  %v2731_v8 = vld [vmem:[%s4174_s5 + $0x18] sm:$0xff]  }
 0x3f2   :  { %v2877_v16 = vpop.eup %2876  ;;  %v1737_v40 = vrot.slane %v1736_v45, 1  ;;  %2664 = vmatprep.subr.bf16.mxu0 %v2938_v24 }
 0x3f3   :  { %v4019_v28 = vmul.f32 %v2877_v16, %v3940_v18  ;;  %v1740_v56 = vsel %vm370_vm1, %v1675_v49, 0.0  ;;  %v4024_v32 = vmul.f32 %v2877_v16, %v3931_v63 }
 0x3f4   :  { %v1738_v10 = vadd.f32 %v1737_v40, %v1736_v45  ;;  %v1741_v6 = vadd.f32 %v1740_v56, %v1739_v43 }
 0x3f5   :  { %v1789_v17 = vmul.f32 %v4019_v28, %v4019_v28  ;;  %v1788_v57 = vmul.f32 %v4024_v32, %v4024_v32 }
 0x3f6   :  { %v1754_v52 = vmax.f32 %v1738_v10, 1e-24  ;;  %v1742_v15 = vrot.slane %v1741_v6, 4 }
 0x3f7   :  { %v1823_v18 = vsel %vm370_vm1, %v1789_v17, 0.0  ;;  %v1820_v39 = vsel %vm370_vm1, %v1788_v57, 0.0 }
 0x3f8   :  { %2880 = vrsqrt.f32 %v1754_v52  ;;  %v1743_v9 = vadd.f32 %v1742_v15, %v1741_v6  ;;  %1824 = vadd.xlane.f32.xlu1 %v1823_v18  ;;  %1821 = vadd.xlane.f32.xlu0 %v1820_v39 }
 0x3fa   :  { %v2879_v63 = vpop.eup %2878  ;;  %v1744_v61 = vrot.slane %v1743_v9, 2 }
 0x3fb   :  { %v4033_v26 = vmul.f32 %v2879_v63, %v3965_v50  ;;  %v4036_v5 = vmul.f32 %v2879_v63, %v3957_v62 }
 0x3fc   :  { %v1745_v55 = vadd.f32 %v1744_v61, %v1743_v9 }
 0x3fd   :  { %v1791_v3 = vmul.f32 %v4033_v26, %v4033_v26  ;;  %v1790_v60 = vmul.f32 %v4036_v5, %v4036_v5 }
 0x3fe   :  { %v1746_v7 = vrot.slane %v1745_v55, 1 }
 0x3ff   :  { %v1829_v13 = vsel %vm370_vm1, %v1791_v3, 0.0  ;;  %v1826_v23 = vsel %vm370_vm1, %v1790_v60, 0.0 }
 0x400   :  { %v1747_v2 = vadd.f32 %v1746_v7, %v1745_v55  ;;  %1830 = vadd.xlane.f32.xlu1 %v1829_v13  ;;  %1827 = vadd.xlane.f32.xlu0 %v1826_v23 }
 0x402   :  { %v2881_v50 = vpop.eup %2880  ;;  %v1755_v47 = vmax.f32 %v1747_v2, 1e-24 }
 0x403   :  { %v4045_v62 = vmul.f32 %v2881_v50, %v3989_v22  ;;  %v4048_v29 = vmul.f32 %v2881_v50, %v3980_v37 }
 0x404   :  { %2882 = vrsqrt.f32 %v1755_v47 }
 0x405   :  { %v1793_v44 = vmul.f32 %v4045_v62, %v4045_v62  ;;  %v1792_v51 = vmul.f32 %v4048_v29, %v4048_v29 }
 0x407   :  { %v1835_v41 = vsel %vm370_vm1, %v1793_v44, 0.0  ;;  %v1832_v54 = vsel %vm370_vm1, %v1792_v51, 0.0 }
 0x408   :  { %1836 = vadd.xlane.f32.xlu1 %v1835_v41  ;;  %1833 = vadd.xlane.f32.xlu0 %v1832_v54 }
 0x40e   :  { %v2883_v14 = vpop.eup %2882 }
 0x40f   :  { %v4056_v20 = vmul.f32 %v2883_v14, %v1659_v36  ;;  %v4058_v22 = vmul.f32 %v2883_v14, %v1658_v21  ;;  %v2729_v21 = vld [vmem:[%s4174_s5 + $0x8] sm:$0xff]   ;;  %v2732_v36 = vld [vmem:[%s4174_s5 + $0x20] sm:$0xff]  }
 0x410   :  { %2665 = vmatpush3.bf16.msra.mxu0 %v2729_v21 }
 0x411   :  { %v1795_v37 = vmul.f32 %v4056_v20, %v4056_v20  ;;  %v1794_v0 = vmul.f32 %v4058_v22, %v4058_v22  ;;  %2666 = vmatprep.subr.bf16.mxu0 %v2938_v24 }
 0x413   :  { %v1841_v35 = vsel %vm370_vm1, %v1795_v37, 0.0  ;;  %v1838_v11 = vsel %vm370_vm1, %v1794_v0, 0.0 }
 0x414   :  { %1842 = vadd.xlane.f32.xlu1 %v1841_v35  ;;  %1839 = vadd.xlane.f32.xlu0 %v1838_v11 }
 0x415   :  { %2667 = vmatpush3.bf16.msra.mxu0 %v2730_v27 }
 0x416   :  { %2668 = vmatprep.subr.bf16.mxu0 %v2938_v24 }
 0x419   :  { %2669 = vmatpush3.bf16.msra.mxu0 %v2731_v8 }
 0x41a   :  { %2670 = vmatprep.subr.bf16.mxu0 %v2938_v24 }
 0x41d   :  { %2671 = vmatpush3.bf16.msra.mxu0 %v2732_v36 }
 0x41e   :  { %2672 = vmatprep.subr.bf16.mxu0 %v2938_v24 }
 0x465   :  { %v1798_v59 = vpop.xlane.xlu1 %1797  ;;  %v1801_v19 = vpop.xlane.xlu0 %1800 }
 0x466   :  { %v1844_v6 = vadd.f32 %v1801_v19, %v1798_v59 }
 0x468   :  { %v1845_v18 = vrot.slane %v1844_v6, 4 }
 0x46a   :  { %v1846_v7 = vadd.f32 %v1845_v18, %v1844_v6 }
 0x46c   :  { %v1847_v51 = vrot.slane %v1846_v7, 2 }
 0x46d   :  { %v1804_v33 = vpop.xlane.xlu1 %1803 }
 0x46e   :  { %v1848_v59 = vadd.f32 %v1847_v51, %v1846_v7 }
 0x471   :  { %v1807_v4 = vpop.xlane.xlu1 %1806 }
 0x472   :  { %v1851_v40 = vadd.f32 %v1807_v4, %v1804_v33 }
 0x474   :  { %v1852_v17 = vrot.slane %v1851_v40, 4 }
 0x475   :  { %v1813_v12 = vpop.xlane.xlu1 %1812  ;;  %v1810_v45 = vpop.xlane.xlu0 %1809 }
 0x476   :  { %v1858_v52 = vadd.f32 %v1813_v12, %v1810_v45  ;;  %v1853_v39 = vadd.f32 %v1852_v17, %v1851_v40  ;;  %v1849_v45 = vrot.slane %v1848_v59, 1 }
 0x478   :  { %v1859_v3 = vrot.slane %v1858_v52, 4  ;;  %v1854_v23 = vrot.slane %v1853_v39, 2  ;;  %v1850_v17 = vadd.f32 %v1849_v45, %v1848_v59 }
 0x47a   :  { %v1860_v47 = vadd.f32 %v1859_v3, %v1858_v52  ;;  %v1855_v54 = vadd.f32 %v1854_v23, %v1853_v39  ;;  %v1900_v3 = vmax.f32 %v1850_v17, 1e-24 }
 0x47c   :  { %v1861_v42 = vrot.slane %v1860_v47, 2  ;;  %v1856_v33 = vrot.slane %v1855_v54, 1 }
 0x47d   :  { %v1819_v49 = vpop.xlane.xlu1 %1818  ;;  %v1816_v16 = vpop.xlane.xlu0 %1815 }
 0x47e   :  { %v1865_v57 = vadd.f32 %v1819_v49, %v1816_v16  ;;  %v1862_v19 = vadd.f32 %v1861_v42, %v1860_v47  ;;  %v1857_v16 = vadd.f32 %v1856_v33, %v1855_v54 }
 0x480   :  { %v1866_v9 = vrot.slane %v1865_v57, 4  ;;  %v1901_v52 = vmax.f32 %v1857_v16, 1e-24 }
 0x482   :  { %v1867_v2 = vadd.f32 %v1866_v9, %v1865_v57  ;;  %2884 = vrsqrt.f32 %v1901_v52 }
 0x484   :  { %v1868_v14 = vrot.slane %v1867_v2, 2 }
 0x485   :  { %v1825_v43 = vpop.xlane.xlu1 %1824  ;;  %v1822_v56 = vpop.xlane.xlu0 %1821 }
 0x486   :  { %v1872_v10 = vadd.f32 %v1825_v43, %v1822_v56  ;;  %v1869_v8 = vadd.f32 %v1868_v14, %v1867_v2 }
 0x488   :  { %v1873_v15 = vrot.slane %v1872_v10, 4  ;;  %v1870_v40 = vrot.slane %v1869_v8, 1 }
 0x48a   :  { %v1874_v60 = vadd.f32 %v1873_v15, %v1872_v10  ;;  %v1863_v10 = vrot.slane %v1862_v19, 1  ;;  %v1871_v15 = vadd.f32 %v1870_v40, %v1869_v8 }
 0x48c   :  { %v1875_v44 = vrot.slane %v1874_v60, 2  ;;  %v2885_v54 = vpop.eup %2884 }
 0x48d   :  { %v1831_v63 = vpop.xlane.xlu1 %1830  ;;  %v1828_v61 = vpop.xlane.xlu0 %1827  ;;  %v1918_v59 = vmul.f32 %v2885_v54, %v3968_v1 }
 0x48e   :  { %v1879_v55 = vadd.f32 %v1831_v63, %v1828_v61  ;;  %v1876_v21 = vadd.f32 %v1875_v44, %v1874_v60  ;;  %v1864_v61 = vadd.f32 %v1863_v10, %v1862_v19 }
 0x490   :  { %v1880_v13 = vrot.slane %v1879_v55, 4  ;;  %v1877_v12 = vrot.slane %v1876_v21, 1  ;;  %v1902_v2 = vmax.f32 %v1864_v61, 1e-24 }
 0x492   :  { %v1881_v50 = vadd.f32 %v1880_v13, %v1879_v55  ;;  %v1878_v6 = vadd.f32 %v1877_v12, %v1876_v21  ;;  %v1903_v13 = vmax.f32 %v1871_v15, 1e-24 }
 0x494   :  { %v1882_v41 = vrot.slane %v1881_v50, 2  ;;  %v1904_v55 = vmax.f32 %v1878_v6, 1e-24 }
 0x495   :  { %v1837_v37 = vpop.xlane.xlu1 %1836  ;;  %v1834_v0 = vpop.xlane.xlu0 %1833 }
 0x496   :  { %v1883_v35 = vadd.f32 %v1882_v41, %v1881_v50  ;;  %v1886_v11 = vadd.f32 %v1837_v37, %v1834_v0 }
 0x498   :  { %v1887_v27 = vrot.slane %v1886_v11, 4  ;;  %v1884_v36 = vrot.slane %v1883_v35, 1 }
 0x49a   :  { %v1888_v4 = vadd.f32 %v1887_v27, %v1886_v11  ;;  %v1885_v43 = vadd.f32 %v1884_v36, %v1883_v35  ;;  %v1919_v27 = vmul.f32 %v2885_v54, %v3961_v53  ;;  %v2733_v54 = vld [vmem:[%s4174_s5 + $0x28] sm:$0xff]  }
 0x49b   :  { %2673 = vmatpush3.bf16.msra.mxu0 %v2733_v54 }
 0x49c   :  { %v1889_v49 = vrot.slane %v1888_v4, 2  ;;  %v1905_v9 = vmax.f32 %v1885_v43, 1e-24  ;;  %2674 = vmatprep.subr.bf16.mxu0 %v2938_v24 }
 0x49e   :  { %v1890_v56 = vadd.f32 %v1889_v49, %v1888_v4  ;;  %2886 = vrsqrt.f32 %v1905_v9 }
 0x49f   :  { %2888 = vrsqrt.f32 %v1904_v55 }
 0x4a0   :  { %v1891_v57 = vrot.slane %v1890_v56, 1  ;;  %2890 = vrsqrt.f32 %v1900_v3 }
 0x4a1   :  { %v1843_v18 = vpop.xlane.xlu1 %1842  ;;  %v1840_v39 = vpop.xlane.xlu0 %1839  ;;  %2892 = vrsqrt.f32 %v1903_v13 }
 0x4a2   :  { %v1893_v63 = vadd.f32 %v1843_v18, %v1840_v39  ;;  %v1892_v60 = vadd.f32 %v1891_v57, %v1890_v56  ;;  %2894 = vrsqrt.f32 %v1902_v2 }
 0x4a4   :  { %v1894_v7 = vrot.slane %v1893_v63, 4  ;;  %v1906_v50 = vmax.f32 %v1892_v60, 1e-24 }
 0x4a6   :  { %v1895_v23 = vadd.f32 %v1894_v7, %v1893_v63  ;;  %2896 = vrsqrt.f32 %v1906_v50 }
 0x4a8   :  { %v1896_v47 = vrot.slane %v1895_v23, 2  ;;  %v2887_v14 = vpop.eup %2886 }
 0x4a9   :  { %v2889_v0 = vpop.eup %2888  ;;  %v1926_v42 = vmul.f32 %v2887_v14, %v4036_v5  ;;  %v1927_v21 = vmul.f32 %v2887_v14, %v4033_v26  ;;  %v2940_v26 = vmov 1983009808  }
 0x4aa   :  { %v1897_v44 = vadd.f32 %v1896_v47, %v1895_v23  ;;  %v2891_v35 = vpop.eup %2890  ;;  %v1924_v33 = vmul.f32 %v2889_v0, %v4024_v32  ;;  %v1925_v8 = vmul.f32 %v2889_v0, %v4019_v28  ;;  %v1975_v16 = vunpack.c.l.s4 %v2940_v26 }
 0x4ab   :  { %v2893_v11 = vpop.eup %2892  ;;  %v1916_v19 = vmul.f32 %v2891_v35, %v3943_v38  ;;  %v1917_v12 = vmul.f32 %v2891_v35, %v3936_v46  ;;  %v1937_v49 = vpack.c.bf16 %v1927_v21, %v1926_v42  ;;  %v1933_v32 = vpack.c.bf16 %v1919_v27, %v1918_v59 }
 0x4ac   :  { %v1898_v51 = vrot.slane %v1897_v44, 1  ;;  %v2895_v36 = vpop.eup %2894  ;;  %v1922_v45 = vmul.f32 %v2893_v11, %v4009_v58  ;;  %v1923_v5 = vmul.f32 %v2893_v11, %v4005_v25  ;;  %v1936_v40 = vpack.c.bf16 %v1925_v8, %v1924_v33 }
 0x4ad   :  { %v1920_v1 = vmul.f32 %v2895_v36, %v3992_v48  ;;  %v1921_v53 = vmul.f32 %v2895_v36, %v3985_v31  ;;  %v1932_v38 = vpack.c.bf16 %v1917_v12, %v1916_v19  ;;  %v1976_v46 = vunpack.c.0.s8 %v1975_v16 }
 0x4ae   :  { %v1899_v41 = vadd.f32 %v1898_v51, %v1897_v44  ;;  %v1935_v56 = vpack.c.bf16 %v1923_v5, %v1922_v45  ;;  %v1961_v10 = vshrl.u32 %v1937_v49, 16  ;;  %v2941_v25 = vmov 1934713408  }
 0x4af   :  { %v1934_v6 = vpack.c.bf16 %v1921_v53, %v1920_v1  ;;  %v2007_v17 = vunpack.c.l.s4 %v2941_v25  ;;  %v1945_v57 = vshrl.u32 %v1933_v32, 16  ;;  %v1960_v52 = vshrl.u32 %v1936_v40, 16 }
 0x4b0   :  { %v1907_v37 = vmax.f32 %v1899_v41, 1e-24  ;;  %v2897_v4 = vpop.eup %2896  ;;  %v1958_v18 = vpack.i.b16 %v1937_v49, %v1936_v40  ;;  %v1944_v39 = vshrl.u32 %v1932_v38, 16  ;;  %v1979_v63 = vsub.s32 %v1976_v46, %v3324_v30  ;;  %v2734_v49 = vld [vmem:[%s4174_s5 + $0x30] sm:$0xff]   ;;  %v2735_v46 = vld [vmem:[%s4174_s5 + $0x38] sm:$0xff]   ;;  %s2955_s5 = smov 96  }
 0x4b1   :  { %v1928_v28 = vmul.f32 %v2897_v4, %v4048_v29  ;;  %v1929_v43 = vmul.f32 %v2897_v4, %v4045_v62  ;;  %v1953_v29 = vshrl.u32 %v1935_v56, 16  ;;  %v1942_v62 = vpack.i.b16 %v1933_v32, %v1932_v38  ;;  %2675 = vmatpush3.bf16.msra.mxu0 %v2734_v49 }
 0x4b2   :  { %2898 = vrsqrt.f32 %v1907_v37  ;;  %v1962_v61 = vpack.i.b16 %v1961_v10, %v1960_v52  ;;  %v1950_v55 = vpack.i.b16 %v1935_v56, %v1934_v6  ;;  %v2008_v3 = vunpack.c.0.s8 %v2007_v17  ;;  %2676 = vmatprep.subr.bf16.mxu0 %v2938_v24 }
 0x4b3   :  { %v1938_v15 = vpack.c.bf16 %v1929_v43, %v1928_v28  ;;  %v1946_v60 = vpack.i.b16 %v1945_v57, %v1944_v39  ;;  %v1952_v7 = vshrl.u32 %v1934_v6, 16  ;;  %v1972_v23 = vcombine.low %v1942_v62, %v1958_v18 }
 0x4b4   :  { %v1973_v47 = vcombine.high %v1942_v62, %v1958_v18  ;;  %v4107_v14 = vsub.s32 %v2008_v3, %v3324_v30  ;;  %v2946_v40 = vmov 0  }
 0x4b5   :  { %v1968_v2 = vshrl.u32 %v1938_v15, 16  ;;  %v2040_v51 = vcombine.low %v1946_v60, %v1962_v61  ;;  %v1980_v37 = vrot.slane %v1972_v23, %v1979_v63  ;;  %v2041_v8 = vcombine.high %v1946_v60, %v1962_v61  ;;  %2677 = vmatpush3.bf16.msra.mxu0 %v2735_v46 }
 0x4b6   :  { %v1987_v42 = vrot.slane %v1973_v47, %v1979_v63 }
 0x4b7   :  { %v2048_v59 = vrot.slane %v2040_v51, %v1979_v63  ;;  %v2055_v1 = vrot.slane %v2041_v8, %v1979_v63 }
 0x4bc   :  { %v2899_v58 = vpop.eup %2898 }
 0x4bd   :  { %v1930_v48 = vmul.f32 %v2899_v58, %v4058_v22  ;;  %v1931_v31 = vmul.f32 %v2899_v58, %v4056_v20  ;;  %v1954_v22 = vpack.i.b16 %v1953_v29, %v1952_v7 }
 0x4bf   :  { %v1939_v9 = vpack.c.bf16 %v1931_v31, %v1930_v48 }
 0x4c1   :  { %v1966_v13 = vpack.i.b16 %v1939_v9, %v1938_v15  ;;  %v1969_v50 = vshrl.u32 %v1939_v9, 16 }
 0x4c3   :  { %v1988_v20 = vcombine.low %v1950_v55, %v1966_v13  ;;  %v1970_v44 = vpack.i.b16 %v1969_v50, %v1968_v2  ;;  %v1989_v41 = vcombine.high %v1950_v55, %v1966_v13 }
 0x4c5   :  { %v1996_v0 = vrot.slane %v1988_v20, %v1979_v63  ;;  %v2056_v35 = vcombine.low %v1954_v22, %v1970_v44  ;;  %v2003_v11 = vrot.slane %v1989_v41, %v1979_v63  ;;  %v2057_v33 = vcombine.high %v1954_v22, %v1970_v44 }
 0x4c7   :  { %v2005_v21 = vcombine.high %v1980_v37, %v1996_v0  ;;  %v2064_v27 = vrot.slane %v2056_v35, %v1979_v63  ;;  %v2020_v19 = vcombine.low %v1987_v42, %v2003_v11  ;;  %v2004_v12 = vcombine.low %v1980_v37, %v1996_v0 }
 0x4c8   :  { %v2071_v5 = vrot.slane %v2057_v33, %v1979_v63  ;;  %v2021_v17 = vcombine.high %v1987_v42, %v2003_v11 }
 0x4c9   :  { %v2019_v36 = vrot.slane %v2005_v21, %v4107_v14  ;;  %v2072_v4 = vcombine.low %v2048_v59, %v2064_v27  ;;  %v2073_v45 = vcombine.high %v2048_v59, %v2064_v27  ;;  %v2028_v26 = vrot.slane %v2020_v19, %v4107_v14  ;;  %v2736_v59 = vld [vmem:[%s4177_s8] sm:$0xff]   ;;  %v2737_v27 = vld [vmem:[%s4177_s8 + $0x8] sm:$0xff]  }
 0x4ca   :  { %v2012_v16 = vrot.slane %v2004_v12, %v4107_v14  ;;  %v2088_v32 = vcombine.low %v2055_v1, %v2071_v5  ;;  %v2089_v38 = vcombine.high %v2055_v1, %v2071_v5  ;;  %v2035_v52 = vrot.slane %v2021_v17, %v4107_v14  ;;  %2683 = vmatpush3.bf16.msra.mxu1 %v2736_v59  ;;  %v2329_v17 = vld [vmem:[%s4176_s7] sm:$0x1] }
 0x4cb   :  { %2118 = vrot.lane.b32.xlu1 %v2019_v36, %s2942_s17  ;;  %v2080_v30 = vrot.slane %v2072_v4, %v4107_v14  ;;  %v2087_v53 = vrot.slane %v2073_v45, %v4107_v14  ;;  %v2037_v56 = vcombine.high %v2019_v36, %v2946_v40  ;;  %v2038_v25 = vcombine.high %v2028_v26, %v2946_v40 }
 0x4cc   :  { %v2036_v28 = vcombine.high %v2012_v16, %v2946_v40  ;;  %v2096_v43 = vrot.slane %v2088_v32, %v4107_v14  ;;  %v2103_v10 = vrot.slane %v2089_v38, %v4107_v14  ;;  %v2039_v31 = vcombine.high %v2035_v52, %v2946_v40  ;;  %2684 = vmatprep.subr.bf16.mxu1 %v2938_v24 }
 0x4cd   :  { %2109 = vrot.lane.b32.xlu0 %v2080_v30, %s2943_s20  ;;  %v2104_v58 = vcombine.high %v2080_v30, %v2946_v40  ;;  %v2105_v6 = vcombine.high %v2087_v53, %v2946_v40 }
 0x4ce   :  { %v2106_v57 = vcombine.high %v2096_v43, %v2946_v40  ;;  %v2107_v48 = vcombine.high %v2103_v10, %v2946_v40  ;;  %2685 = vmatpush3.bf16.msra.mxu1 %v2737_v27 }
 0x4cf   :  { %2130 = vrot.lane.b32.xlu1 %v2028_v26, %s2944_s21 }
 0x4d1   :  { %2121 = vrot.lane.b32.xlu0 %v2087_v53, %s2945_s22 }
 0x4d3   :  { %2112 = vrot.lane.b32.xlu1 %v2036_v28, %s2947_s23 }
 0x4d5   :  { %2133 = vrot.lane.b32.xlu0 %v2096_v43, %s2948_s24 }
 0x4d7   :  { %2124 = vrot.lane.b32.xlu1 %v2037_v56, %s2949_s25 }
 0x4d9   :  { %2145 = vrot.lane.b32.xlu0 %v2103_v10, %s2950_s26 }
 0x4db   :  { %2115 = vrot.lane.b32.xlu1 %v2104_v58, %s2951_s2  ;;  %v2322_v58 = vld [vmem:[%s4175_s6] sm:$0x1] }
 0x4dd   :  { %2127 = vrot.lane.b32.xlu0 %v2105_v6, %s2952_s27 }
 0x4df   :  { %2136 = vrot.lane.b32.xlu1 %v2038_v25, %s2953_s28 }
 0x4e1   :  { %2139 = vrot.lane.b32.xlu0 %v2106_v57, %s2954_s29 }
 0x4e3   :  { %2142 = vrot.lane.b32.xlu1 %v2035_v52, %s2955_s5 }
 0x4e5   :  { %2151 = vrot.lane.b32.xlu0 %v2107_v48, %s2956_s30 }
 0x4e7   :  { %2148 = vrot.lane.b32.xlu1 %v2039_v31, %s2957_s12 }
 0x53d   :  { %v2119_v15 = vpop.permute.xlu1 %2118 }
 0x53f   :  { %v2110_v18 = vpop.permute.xlu0 %2109 }
 0x540   :  { %v2155_v55 = vsel %vm370_vm1, %v2012_v16, %v2110_v18 }
 0x541   :  { %v2131_v39 = vpop.permute.xlu1 %2130 }
 0x543   :  { %v2122_v29 = vpop.permute.xlu0 %2121 }
 0x545   :  { %v2113_v9 = vpop.permute.xlu1 %2112 }
 0x546   :  { %v2157_v3 = vsel %vm160_vm0, %v2155_v55, %v2113_v9 }
 0x547   :  { %v2134_v62 = vpop.permute.xlu0 %2133 }
 0x549   :  { %v2125_v63 = vpop.permute.xlu1 %2124 }
 0x54b   :  { %v2146_v61 = vpop.permute.xlu0 %2145 }
 0x54d   :  { %v2116_v60 = vpop.permute.xlu1 %2115 }
 0x54e   :  { %v2160_v7 = vsel %vm2158_vm4, %v2157_v3, %v2116_v60 }
 0x54f   :  { %v2162_v13 = vsel %vm1165_vm3, %v2160_v7, %v2119_v15  ;;  %v2128_v23 = vpop.permute.xlu0 %2127 }
 0x550   :  { %v2165_v2 = vsel %vm2163_vm5, %v2162_v13, %v2122_v29 }
 0x551   :  { %v2168_v50 = vsel %vm2166_vm6, %v2165_v2, %v2125_v63  ;;  %v2137_v22 = vpop.permute.xlu1 %2136 }
 0x552   :  { %v2171_v47 = vsel %vm2169_vm7, %v2168_v50, %v2128_v23 }
 0x553   :  { %v2174_v20 = vsel %vm2172_vm8, %v2171_v47, %v2131_v39  ;;  %v2140_v51 = vpop.permute.xlu0 %2139 }
 0x554   :  { %v2177_v44 = vsel %vm2175_vm9, %v2174_v20, %v2134_v62 }
 0x555   :  { %v2180_v41 = vsel %vm2178_vm10, %v2177_v44, %v2137_v22  ;;  %v2143_v54 = vpop.permute.xlu1 %2142 }
 0x556   :  { %v2183_v14 = vsel %vm2181_vm11, %v2180_v41, %v2140_v51 }
 0x557   :  { %v2186_v37 = vsel %vm2184_vm12, %v2183_v14, %v2143_v54  ;;  %v2152_v11 = vpop.permute.xlu0 %2151 }
 0x558   :  { %v2189_v0 = vsel %vm2187_vm13, %v2186_v37, %v2146_v61 }
 0x559   :  { %v2149_v35 = vpop.permute.xlu1 %2148 }
 0x55a   :  { %v2192_v42 = vsel %vm2190_vm14, %v2189_v0, %v2149_v35  ;;  %v2419_v35 = vld [vmem:[%s4178_s9] sm:$0x1]  ;;  %s2958_s9 = smov [#allocation2]  }
 0x55b   :  { %v2195_v21 = vsel %vm2193_vm15, %v2192_v42, %v2152_v11  ;;  %s2450_s20 = sshll.u32 %s2958_s9, 4  ;;  %s2451_s20 = int_to_ptr.vmem [resolvable:$true] %s2450_s20 }
 0x55c   :  { %2679 = vmatmul.mubr.bf16.vlgmr.msra.gmra.mrb[32].mxu0 %v2195_v21  ;;  %v2426_v21 = vld [vmem:[%s4179_s10] sm:$0x1]  ;;  %s2914_s10 = scalar_lea.vmem %s2451_s20, 128  ;;  %p2919_p1 = scmp.lt.s32.totalorder %s2451_s20, %s2451_s20 }
 0x55d   :  { %p2915_p0 = scmp.ne.s32.totalorder %s2451_s20, %s2914_s10  ;;  %p2920_p2 = scmp.lt.s32.totalorder %s2914_s10, %s2914_s10 }
 0x55f   :  { %p2921_p3 = por %p2920_p2, %p2919_p1 }
 0x561   :  { %p2922_p4 = pnand %p2921_p3, %p2915_p0 }
 0x62f   :  { %v2295_v33 = vpop.f32.mrb[32].mxu0 }
 0x630   :  { %v2301_v8 = vsel %vm1165_vm3, %v2295_v33, 0.0  ;;  %v2680_v36 = vpop.f32.mrb[33].mxu0 }
 0x631   :  { %v2302_v4 = vrot.slane %v2301_v8, 4  ;;  %v2298_v19 = vpop.f32.mrb[34].mxu0 }
 0x632   :  { %v2681_v12 = vpop.f32.mrb[35].mxu0 }
 0x633   :  { %v2303_v30 = vadd.f32 %v2302_v4, %v2301_v8 }
 0x635   :  { %v2304_v45 = vrot.slane %v2303_v30, 2 }
 0x637   :  { %v2305_v5 = vadd.f32 %v2304_v45, %v2303_v30 }
 0x639   :  { %v2306_v49 = vrot.slane %v2305_v5, 1 }
 0x63b   :  { %v2307_v26 = vadd.f32 %v2306_v49, %v2305_v5 }
 0x63d   :  { %v2309_v16 = vmul.f32 0.125, %v2307_v26 }
 0x63f   :  { %v2310_v1 = vsub.f32 %v2295_v33, %v2309_v16 }
 0x641   :  { %v2311_v53 = vmul.f32 %v2310_v1, %v2310_v1 }
 0x643   :  { %v2312_v32 = vsel %vm1165_vm3, %v2311_v53, 0.0 }
 0x644   :  { %v2313_v40 = vrot.slane %v2312_v32, 4 }
 0x646   :  { %v2314_v24 = vadd.f32 %v2313_v40, %v2312_v32 }
 0x648   :  { %v2315_v28 = vrot.slane %v2314_v24, 2 }
 0x64a   :  { %v2316_v43 = vadd.f32 %v2315_v28, %v2314_v24 }
 0x64c   :  { %v2317_v38 = vrot.slane %v2316_v43, 1 }
 0x64e   :  { %v2318_v56 = vadd.f32 %v2317_v38, %v2316_v43 }
 0x650   :  { %v2319_v46 = vmul.f32 0.125, %v2318_v56 }
 0x652   :  { %v2320_v10 = vadd.f32 1e-05, %v2319_v46 }
 0x654   :  { %2900 = vrsqrt.f32 %v2320_v10 }
 0x65e   :  { %v2901_v6 = vpop.eup %2900 }
 0x65f   :  { %v2323_v25 = vmul.f32 %v2901_v6, %v2322_v58 }
 0x661   :  { %v2327_v57 = vrot.slane %v2323_v25, %v3330_v34  ;;  %v2330_v52 = vmul.f32 %v2323_v25, %v2309_v16 }
 0x663   :  { %v2331_v48 = vsub.f32 %v2329_v17, %v2330_v52  ;;  %v2328_v31 = vmul.f32 %v2327_v57, %v2295_v33 }
 0x665   :  { %v2336_v15 = vrot.slane %v2331_v48, %v3330_v34 }
 0x667   :  { %v2338_v18 = vadd.f32 %v2336_v15, %v2328_v31 }
 0x669   :  { %v2339_v39 = vpack.c.bf16 %v2338_v18, %v2338_v18 }
 0x66b   :  { %2687 = vmatmul.mubr.msk.bf16.vlgmr.msra.gmra.mrb[32].mxu1 %vm1165_vm3, %v2339_v39 }
 0x73e   :  { %v2393_v29 = vpop.f32.mrb[32].mxu1 }
 0x73f   :  { %v2399_v9 = vsel %vm1165_vm3, %v2393_v29, 0.0  ;;  %v2688_v62 = vpop.f32.mrb[33].mxu1 }
 0x740   :  { %v2400_v63 = vrot.slane %v2399_v9, 4  ;;  %v2396_v61 = vpop.f32.mrb[34].mxu1 }
 0x741   :  { %v2689_v55 = vpop.f32.mrb[35].mxu1 }
 0x742   :  { %v2401_v3 = vadd.f32 %v2400_v63, %v2399_v9 }
 0x744   :  { %v2402_v60 = vrot.slane %v2401_v3, 2 }
 0x746   :  { %v2403_v7 = vadd.f32 %v2402_v60, %v2401_v3 }
 0x748   :  { %v2404_v13 = vrot.slane %v2403_v7, 1 }
 0x74a   :  { %v2405_v23 = vadd.f32 %v2404_v13, %v2403_v7 }
 0x74c   :  { %v2406_v2 = vmul.f32 0.125, %v2405_v23 }
 0x74e   :  { %v2407_v50 = vsub.f32 %v2393_v29, %v2406_v2 }
 0x750   :  { %v2408_v22 = vmul.f32 %v2407_v50, %v2407_v50 }
 0x752   :  { %v2409_v47 = vsel %vm1165_vm3, %v2408_v22, 0.0 }
 0x753   :  { %v2410_v20 = vrot.slane %v2409_v47, 4 }
 0x755   :  { %v2411_v44 = vadd.f32 %v2410_v20, %v2409_v47 }
 0x757   :  { %v2412_v51 = vrot.slane %v2411_v44, 2 }
 0x759   :  { %v2413_v41 = vadd.f32 %v2412_v51, %v2411_v44 }
 0x75b   :  { %v2414_v54 = vrot.slane %v2413_v41, 1 }
 0x75d   :  { %v2415_v14 = vadd.f32 %v2414_v54, %v2413_v41 }
 0x75f   :  { %v2416_v37 = vmul.f32 0.125, %v2415_v14 }
 0x761   :  { %v2417_v0 = vadd.f32 1e-05, %v2416_v37 }
 0x763   :  { %2902 = vrsqrt.f32 %v2417_v0 }
 0x76d   :  { %v2903_v11 = vpop.eup %2902 }
 0x76e   :  { %v2420_v42 = vmul.f32 %v2903_v11, %v2419_v35 }
 0x770   :  { %v2424_v59 = vrot.slane %v2420_v42, %v3330_v34  ;;  %v2427_v27 = vmul.f32 %v2420_v42, %v2406_v2 }
 0x772   :  { %v2428_v33 = vsub.f32 %v2426_v21, %v2427_v27  ;;  %v2425_v8 = vmul.f32 %v2424_v59, %v2393_v29 }
 0x774   :  { %v2433_v36 = vrot.slane %v2428_v33, %v3330_v34 }
 0x776   :  { %v2435_v4 = vadd.f32 %v2433_v36, %v2425_v8 }
 0x778   :  { %v2510_v19 = vmul.f32 -1.442695, %v2435_v4 }
 0x77a   :  { %2904 = vpow2.f32 %v2510_v19 }
 0x784   :  { %v2905_v12 = vpop.eup %2904 }
 0x785   :  { %v2439_v30 = vadd.f32 1.0, %v2905_v12 }
 0x787   :  { %2906 = vrcp.f32 %v2439_v30 }
 0x791   :  { %v2907_v45 = vpop.eup %2906 }
 0x792   :  { %v2442_v5 = vmul.f32 %v2907_v45, %v2338_v18 }
 0x794   :  { %2443 = vst.msk [vmem:[#allocation2] sm:$0xff] %vm1165_vm3, %v2442_v5 }
 0x795   :  { %2925 = shalt.err (!%p2922_p4)
}
 0x796   :  { %s2926_s23 = scalar_lea.hbm %s4180_s11, 128 }
 0x797   :  { %p2927_p5 = scmp.ne.s32.totalorder %s4180_s11, %s2926_s23  ;;  %p2930_p6 = scmp.lt.u32.totalorder %s2926_s23, %s4180_s11 }
 0x799   :  { %p2932_p7 = pnand %p2930_p6, %p2927_p5 }
 0x79b   :  { %2935 = shalt.err (!%p2932_p7)
}
 0x79c   :  { %2453 = dma.vmem_to_hbm [thread:$0]  %s2451_s20, 128, %s4180_s11, [#allocation3]  }
 0x79d   :  { %2936 = dma.done.wait [#allocation3], 128  }
 0x79e   :  { %2937 = vsyncadd [#allocation3], 4294967168 }
 0x79f   :  { %2457 = vsyncpa [#allocation3], 1 }

</bundles_post_ra>
